<compile_context>
chip_gen: v5e
topology: v5e:2x2
jax: 0.10.0
libtpu: 0.0.40
codegen_flags: <defaults>
</compile_context>

<pallas_src>
import functools

import jax
import jax.numpy as jnp
from jax.experimental import pallas as pl
from jax.experimental.pallas import tpu as pltpu


# ----------------------------------------------------------------------------
# Math helpers (kernel-side)
# ----------------------------------------------------------------------------
def _erf_approx(x):
    # Abramowitz & Stegun 7.1.26 (|error| < 1.5e-7).  The divide is replaced
    # by an EUP approximate reciprocal plus one Newton step (~fp32 accurate).
    a1, a2, a3, a4, a5 = (0.254829592, -0.284496736, 1.421413741,
                          -1.453152027, 1.061405429)
    p = 0.3275911
    ax = jnp.abs(x)
    denom = 1.0 + p * ax
    t = pl.reciprocal(denom, approx=True)
    t = t * (2.0 - denom * t)                      # one Newton refinement step
    poly = ((((a5 * t + a4) * t + a3) * t + a2) * t + a1) * t
    y = 1.0 - poly * jnp.exp(-ax * ax)
    return jnp.where(x < 0, -y, y)


def _gelu_exact(x):
    # PyTorch nn.GELU default = exact erf form (not the tanh approximation).
    return 0.5 * x * (1.0 + _erf_approx(x * 0.7071067811865476))


def _layer_norm(h, w, b):
    mu = jnp.mean(h, axis=-1, keepdims=True)
    var = jnp.mean(jnp.square(h - mu), axis=-1, keepdims=True)
    return (h - mu) * jax.lax.rsqrt(var + 1e-5) * w + b


# ----------------------------------------------------------------------------
# Fused ViT kernel: patch embed -> L transformer layers -> mean pool + head
# ----------------------------------------------------------------------------
def vit_kernel(patches_ref, embw_ref, posb_ref, vecs_ref, wqkv_ref, wideb_ref,
               wo_ref, w1_ref, w2_ref, headw_ref, headb_ref, o_ref,
               acc_ref, ctx_ref, *, n_heads, d_k, n_tokens, ffn_tile):
    # Grid: (batch_chunks, n_layers); layer axis (last) is sequential.
    # acc_ref: (M, D) f32 resident residual stream (M = chunk of B*N rows).
    # ctx_ref: (M, H*d_k) bf16 slab collecting per-head attention contexts.
    layer = pl.program_id(1)
    m, d = acc_ref.shape
    bsz = m // n_tokens                     # samples in this batch chunk
    hd = n_heads * d_k

    # ---- patch embedding + positional embedding (first layer step only) ----
    @pl.when(layer == 0)
    def _():
        y = jnp.dot(patches_ref[...].astype(jnp.bfloat16), embw_ref[...],
                    preferred_element_type=jnp.float32)
        y = y.reshape(bsz, n_tokens, d) + posb_ref[...]   # pos-emb (+embed bias)
        acc_ref[...] = y.reshape(m, d)

    vecs = vecs_ref[...]                    # (6, D) packed fp32 vectors
    ln1_w, ln1_b = vecs[0:1], vecs[1:2]
    bo, ln2_w = vecs[2:3], vecs[3:4]
    ln2_b, b2 = vecs[4:5], vecs[5:6]
    wide = wideb_ref[...]                   # (1, 3*Hd + ffn) packed wide biases
    bqkv = wide[:, :3 * hd]
    b1 = wide[:, 3 * hd:]

    x = acc_ref[...]                        # (M, D) fp32 residual stream

    # ---- multi-head self-attention (pre-norm); 1/sqrt(d_k) folded into Wq --
    h = _layer_norm(x, ln1_w, ln1_b)
    qkv = (jnp.dot(h.astype(jnp.bfloat16), wqkv_ref[...],
                   preferred_element_type=jnp.float32)
           + bqkv).astype(jnp.bfloat16)     # (M, 3*Hd)

    for hh in range(n_heads):               # softmax per head, batched over samples
        s = hh * d_k
        qh = qkv[:, s:s + d_k].reshape(bsz, n_tokens, d_k)
        kh = qkv[:, hd + s:hd + s + d_k].reshape(bsz, n_tokens, d_k)
        vh = qkv[:, 2 * hd + s:2 * hd + s + d_k].reshape(bsz, n_tokens, d_k)
        scores = jax.lax.dot_general(                    # 'bqd,bkd->bqk'
            qh, kh, (((2,), (2,)), ((0,), (0,))),
            preferred_element_type=jnp.float32)
        scores = scores - jnp.max(scores, axis=-1, keepdims=True)
        pexp = jnp.exp(scores)
        pexp = pexp * pl.reciprocal(jnp.sum(pexp, axis=-1, keepdims=True),
                                    approx=True)
        ctx = jax.lax.dot_general(                       # 'bqk,bkd->bqd'
            pexp.astype(jnp.bfloat16), vh, (((2,), (1,)), ((0,), (0,))),
            preferred_element_type=jnp.float32)
        # collect all heads into one slab -> single out-projection matmul
        ctx_ref[:, s:s + d_k] = ctx.reshape(m, d_k).astype(jnp.bfloat16)

    attn = jnp.dot(ctx_ref[...], wo_ref[...],            # (M,Hd) @ (Hd,D)
                   preferred_element_type=jnp.float32)
    x = x + attn + bo                        # residual (+ out-proj bias once)

    # ---- feed-forward (pre-norm), tiled along hidden dim, exact GELU -------
    h2 = _layer_norm(x, ln2_w, ln2_b).astype(jnp.bfloat16)
    ffn = w1_ref.shape[1]
    f_out = jnp.zeros((m, d), jnp.float32)
    for c0 in range(0, ffn, ffn_tile):
        c1 = min(c0 + ffn_tile, ffn)
        f = jnp.dot(h2, w1_ref[:, c0:c1],
                    preferred_element_type=jnp.float32) + b1[:, c0:c1]
        f = _gelu_exact(f)
        f_out = f_out + jnp.dot(f.astype(jnp.bfloat16), w2_ref[c0:c1, :],
                                preferred_element_type=jnp.float32)
    acc_ref[...] = x + f_out + b2            # residual (+ FFN bias2 once)
    # TODO(synk): dropout layers inside the block are identity (inference mode).

    # ---- mean-pool + classification head (last layer step only) ------------
    @pl.when(layer == pl.num_programs(1) - 1)
    def _():
        pooled = jnp.mean(acc_ref[...].reshape(bsz, n_tokens, d), axis=1)
        o_ref[...] = jnp.dot(pooled.astype(jnp.bfloat16), headw_ref[...],
                             preferred_element_type=jnp.float32) + headb_ref[...]
        # TODO(synk): nn.Dropout in the output head is identity (eval mode).


# ----------------------------------------------------------------------------
# Wrapper (pallas_call plumbing)
# ----------------------------------------------------------------------------
def run_vit_stack(patches2d, p, *, n_heads, d_k, n_tokens,
                  batch_chunks=1, ffn_tile=512):
    m, p_dim = patches2d.shape
    n_layers, _, hd3 = p["wqkv"].shape
    d = p["embed_w"].shape[1]
    hd = p["wo"].shape[1]
    ffn = p["w1"].shape[2]
    c_pad = p["head_w"].shape[1]
    wide_w = p["wide_b"].shape[2]

    assert m % batch_chunks == 0
    chunk = m // batch_chunks
    assert chunk % n_tokens == 0
    bsz = m // n_tokens
    bsz_chunk = chunk // n_tokens
    ffn_tile = min(ffn_tile, ffn)

    kernel = functools.partial(vit_kernel, n_heads=n_heads, d_k=d_k,
                               n_tokens=n_tokens, ffn_tile=ffn_tile)
    return pl.pallas_call(
        kernel,
        out_shape=jax.ShapeDtypeStruct((bsz, c_pad), jnp.float32),
        grid=(batch_chunks, n_layers),
        in_specs=[
            pl.BlockSpec((chunk, p_dim), lambda c, l: (c, 0)),        # patches
            pl.BlockSpec((p_dim, d), lambda c, l: (0, 0)),            # embed W
            pl.BlockSpec((n_tokens, d), lambda c, l: (0, 0)),         # pos + embed_b
            pl.BlockSpec((None, 6, d), lambda c, l: (l, 0, 0)),       # LN / D-wide biases
            pl.BlockSpec((None, d, hd3), lambda c, l: (l, 0, 0)),     # fused Wqkv
            pl.BlockSpec((None, 1, wide_w), lambda c, l: (l, 0, 0)),  # bqkv | b1 packed
            pl.BlockSpec((None, hd, d), lambda c, l: (l, 0, 0)),      # Wo
            pl.BlockSpec((None, d, ffn), lambda c, l: (l, 0, 0)),     # W1
            pl.BlockSpec((None, ffn, d), lambda c, l: (l, 0, 0)),     # W2
            pl.BlockSpec((d, c_pad), lambda c, l: (0, 0)),            # head W (padded)
            pl.BlockSpec((1, c_pad), lambda c, l: (0, 0)),            # head b (padded)
        ],
        out_specs=pl.BlockSpec((bsz_chunk, c_pad), lambda c, l: (c, 0)),
        scratch_shapes=[pltpu.VMEM((chunk, d), jnp.float32),     # residual stream
                        pltpu.VMEM((chunk, hd), jnp.bfloat16)],  # per-head ctx slab
        compiler_params=pltpu.CompilerParams(
            dimension_semantics=("parallel", "arbitrary"),
            vmem_limit_bytes=56 * 1024 * 1024),
    )(patches2d, p["embed_w"], p["posb"], p["vecs"], p["wqkv"], p["wide_b"],
      p["wo"], p["w1"], p["w2"], p["head_w"], p["head_b"])


# ----------------------------------------------------------------------------
# Model glue & parameters
# ----------------------------------------------------------------------------
def extract_patches(x, patch_size):
    # einops: 'b c (h1 h2) (w1 w2) -> b (h1 w1) (c h2 w2)'  (pure layout glue)
    b, c, h, w = x.shape
    h1, w1 = h // patch_size, w // patch_size
    x = x.reshape(b, c, h1, patch_size, w1, patch_size)
    x = jnp.transpose(x, (0, 2, 4, 1, 3, 5))
    return x.reshape(b, h1 * w1, c * patch_size * patch_size)


def init_params(key, *, img_size, patch_size, n_channels, n_classes, n_layers,
                n_heads, embed_dim, d_k, ffn_hidden_dim):
    n_patches = (img_size // patch_size) ** 2
    patch_dim = patch_size * patch_size * n_channels

    def nrm(k, shape, scale=0.02):
        return scale * jax.random.normal(k, shape, jnp.float32)

    keys = iter(jax.random.split(key, 6 * n_layers + 4))

    # Per-layer parameters mirroring the PyTorch module structure (fp32).
    blocks = []
    for _ in range(n_layers):
        blocks.append(dict(
            ln1_w=jnp.ones((embed_dim,), jnp.float32),
            ln1_b=jnp.zeros((embed_dim,), jnp.float32),
            wq=nrm(next(keys), (embed_dim, n_heads * d_k)),
            bq=jnp.zeros((n_heads * d_k,), jnp.float32),
            wk=nrm(next(keys), (embed_dim, n_heads * d_k)),
            bk=jnp.zeros((n_heads * d_k,), jnp.float32),
            wv=nrm(next(keys), (embed_dim, n_heads * d_k)),
            bv=jnp.zeros((n_heads * d_k,), jnp.float32),
            wo=nrm(next(keys), (n_heads * d_k, embed_dim)),
            bo=jnp.zeros((embed_dim,), jnp.float32),
            ln2_w=jnp.ones((embed_dim,), jnp.float32),
            ln2_b=jnp.zeros((embed_dim,), jnp.float32),
            w1=nrm(next(keys), (embed_dim, ffn_hidden_dim)),
            b1=jnp.zeros((ffn_hidden_dim,), jnp.float32),
            w2=nrm(next(keys), (ffn_hidden_dim, embed_dim)),
            b2=jnp.zeros((embed_dim,), jnp.float32),
        ))

    # Stack per-layer weights (leading layer axis), fuse QKV, fold 1/sqrt(d_k)
    # into the q projection, pack small vectors, cast matrices to bf16.
    scale = 1.0 / float(d_k) ** 0.5
    vecs = jnp.stack([jnp.stack([b_["ln1_w"], b_["ln1_b"], b_["bo"],
                                 b_["ln2_w"], b_["ln2_b"], b_["b2"]])
                      for b_ in blocks])                                  # (L,6,D)
    wqkv = jnp.stack([jnp.concatenate([b_["wq"] * scale, b_["wk"], b_["wv"]], 1)
                      for b_ in blocks]).astype(jnp.bfloat16)             # (L,D,3Hd)
    wide_b = jnp.stack([jnp.concatenate([b_["bq"] * scale, b_["bk"], b_["bv"],
                                         b_["b1"]])[None, :]
                        for b_ in blocks])                                # (L,1,3Hd+ffn)
    wo = jnp.stack([b_["wo"] for b_ in blocks]).astype(jnp.bfloat16)
    w1 = jnp.stack([b_["w1"] for b_ in blocks]).astype(jnp.bfloat16)
    w2 = jnp.stack([b_["w2"] for b_ in blocks]).astype(jnp.bfloat16)

    # Output head: zero-pad classes to a 128-lane output for dense stores.
    c_pad = max(128, -(-n_classes // 128) * 128)
    head_w = nrm(next(keys), (embed_dim, n_classes))
    head_b = jnp.zeros((n_classes,), jnp.float32)
    pos = jax.random.normal(next(keys), (n_patches, embed_dim), jnp.float32)
    embed_w = nrm(next(keys), (patch_dim, embed_dim))
    embed_b = jnp.zeros((embed_dim,), jnp.float32)

    return dict(
        posb=pos + embed_b[None, :],       # embed bias folded into pos-emb add
        embed_w=embed_w.astype(jnp.bfloat16),
        vecs=vecs, wqkv=wqkv, wide_b=wide_b, wo=wo, w1=w1, w2=w2,
        head_w=jnp.zeros((embed_dim, c_pad), jnp.float32)
                 .at[:, :n_classes].set(head_w).astype(jnp.bfloat16),
        head_b=jnp.zeros((1, c_pad), jnp.float32).at[0, :n_classes].set(head_b),
    )


def vision_transformer_forward(x, params, *, patch_size, n_heads, d_k,
                               n_classes, batch_chunks=1):
    # batch_chunks > 1 splits the batch across the leading "parallel" grid
    # axis (use a multiple of 2 on v7x to occupy both TensorCores); 1 keeps
    # the whole batch in a single grid step (best on 1-TC v5e/v6e).
    patches = extract_patches(x, patch_size)                    # (B, N, P)
    bsz, n_tokens, p_dim = patches.shape
    logits_pad = run_vit_stack(patches.reshape(bsz * n_tokens, p_dim), params,
                               n_heads=n_heads, d_k=d_k, n_tokens=n_tokens,
                               batch_chunks=batch_chunks)       # (B, C_pad)
    return logits_pad[:, :n_classes]


# ----------------------------------------------------------------------------
# Main
# ----------------------------------------------------------------------------
if __name__ == "__main__":
    img_size = 16
    patch_size = 4
    n_channels = 4
    n_classes = 10
    n_layers = 2
    n_heads = 4
    embed_dim = 32
    d_k = 8
    ffn_hidden_dim = 64
    batch = 2

    key = jax.random.PRNGKey(0)
    k_x, k_p = jax.random.split(key)
    x = jax.random.normal(k_x, (batch, n_channels, img_size, img_size),
                          jnp.float32)
    params = init_params(k_p, img_size=img_size, patch_size=patch_size,
                         n_channels=n_channels, n_classes=n_classes,
                         n_layers=n_layers, n_heads=n_heads,
                         embed_dim=embed_dim, d_k=d_k,
                         ffn_hidden_dim=ffn_hidden_dim)

    fwd = jax.jit(functools.partial(
        vision_transformer_forward, patch_size=patch_size, n_heads=n_heads,
        d_k=d_k, n_classes=n_classes, batch_chunks=1))

    out = fwd(x, params)
    out = jax.block_until_ready(out)
    assert out.shape == (batch, n_classes), out.shape
    print("KERNEL_OK")
</pallas_src>

<mosaic_0001>
module attributes {stable_mosaic.version = 11 : i64} {
  func.func @vit_kernel(%arg0: i32, %arg1: i32, %arg2: memref<32x64xf32, #tpu.memory_space<vmem>>, %arg3: memref<64x32xbf16, #tpu.memory_space<vmem>>, %arg4: memref<16x32xf32, #tpu.memory_space<vmem>>, %arg5: memref<1x6x32xf32, #tpu.memory_space<vmem>>, %arg6: memref<1x32x96xbf16, #tpu.memory_space<vmem>>, %arg7: memref<1x1x160xf32, #tpu.memory_space<vmem>>, %arg8: memref<1x32x32xbf16, #tpu.memory_space<vmem>>, %arg9: memref<1x32x64xbf16, #tpu.memory_space<vmem>>, %arg10: memref<1x64x32xbf16, #tpu.memory_space<vmem>>, %arg11: memref<32x128xbf16, #tpu.memory_space<vmem>>, %arg12: memref<1x128xf32, #tpu.memory_space<vmem>>, %arg13: memref<2x128xf32, #tpu.memory_space<vmem>>, %arg14: memref<32x32xf32, #tpu.memory_space<vmem>>, %arg15: memref<32x32xbf16, #tpu.memory_space<vmem>>) attributes {dimension_semantics = [#tpu.dimension_semantics<parallel>, #tpu.dimension_semantics<arbitrary>], iteration_bounds = array<i64: 1, 2>, scalar_prefetch = 0 : i64, scratch_operands = 2 : i64, tpu.core_type = #tpu.core_type<tc>, window_params = [{transform_indices = @transform_0, window_bounds = array<i64: 32, 64>}, {pipeline_mode = #tpu.pipeline_mode<synchronous>, transform_indices = @transform_1, window_bounds = array<i64: 64, 32>}, {pipeline_mode = #tpu.pipeline_mode<synchronous>, transform_indices = @transform_2, window_bounds = array<i64: 16, 32>}, {transform_indices = @transform_3, window_bounds = array<i64: 1, 6, 32>}, {transform_indices = @transform_4, window_bounds = array<i64: 1, 32, 96>}, {transform_indices = @transform_5, window_bounds = array<i64: 1, 1, 160>}, {transform_indices = @transform_6, window_bounds = array<i64: 1, 32, 32>}, {transform_indices = @transform_7, window_bounds = array<i64: 1, 32, 64>}, {transform_indices = @transform_8, window_bounds = array<i64: 1, 64, 32>}, {pipeline_mode = #tpu.pipeline_mode<synchronous>, transform_indices = @transform_9, window_bounds = array<i64: 32, 128>}, {pipeline_mode = #tpu.pipeline_mode<synchronous>, transform_indices = @transform_10, window_bounds = array<i64: 1, 128>}, {transform_indices = @transform_11, window_bounds = array<i64: 2, 128>}]} {
    %c0_i32 = arith.constant 0 : i32
    %0 = arith.cmpi eq, %arg1, %c0_i32 : i32
    %1 = arith.extui %0 : i1 to i32
    %c0_i32_0 = arith.constant 0 : i32
    %2 = arith.cmpi ne, %1, %c0_i32_0 : i32
    scf.if %2 {
      %c0_75 = arith.constant 0 : index
      %c0_76 = arith.constant 0 : index
      %224 = vector.load %arg2[%c0_75, %c0_76] : memref<32x64xf32, #tpu.memory_space<vmem>>, vector<32x64xf32>
      %225 = arith.truncf %224 : vector<32x64xf32> to vector<32x64xbf16>
      %c0_77 = arith.constant 0 : index
      %c0_78 = arith.constant 0 : index
      %226 = vector.load %arg3[%c0_77, %c0_78] : memref<64x32xbf16, #tpu.memory_space<vmem>>, vector<64x32xbf16>
      %cst_79 = arith.constant dense<0.000000e+00> : vector<32x32xf32>
      %227 = tpu.matmul %225, %226, %cst_79 {dimension_numbers = #tpu.dot_dimension_numbers<[1], [0], [0], [1], [0, 0, 1, 1], [], []>} : vector<32x64xbf16>, vector<64x32xbf16>, vector<32x32xf32> -> vector<32x32xf32>
      %228 = vector.shape_cast %227 : vector<32x32xf32> to vector<2x16x32xf32>
      %c0_80 = arith.constant 0 : index
      %c0_81 = arith.constant 0 : index
      %229 = vector.load %arg4[%c0_80, %c0_81] : memref<16x32xf32, #tpu.memory_space<vmem>>, vector<16x32xf32>
      %230 = vector.shape_cast %229 : vector<16x32xf32> to vector<1x16x32xf32>
      %231 = vector.broadcast %230 : vector<1x16x32xf32> to vector<2x16x32xf32>
      %232 = arith.addf %228, %231 : vector<2x16x32xf32>
      %233 = vector.shape_cast %232 : vector<2x16x32xf32> to vector<32x32xf32>
      %c0_82 = arith.constant 0 : index
      %c0_83 = arith.constant 0 : index
      %234 = vector.load %arg14[%c0_82, %c0_83] : memref<32x32xf32, #tpu.memory_space<vmem>>, vector<32x32xf32>
      tpu.vector_store %arg14[%c0_82, %c0_83], %233 {strides = array<i32>} : memref<32x32xf32, #tpu.memory_space<vmem>>, vector<32x32xf32>,
    } else {
    }
    %c0 = arith.constant 0 : index
    %c0_1 = arith.constant 0 : index
    %c0_2 = arith.constant 0 : index
    %3 = vector.load %arg5[%c0, %c0_1, %c0_2] : memref<1x6x32xf32, #tpu.memory_space<vmem>>, vector<1x6x32xf32>
    %4 = vector.shape_cast %3 : vector<1x6x32xf32> to vector<6x32xf32>
    %5 = vector.extract_strided_slice %4 {offsets = [0, 0], sizes = [1, 32], strides = [1, 1]} : vector<6x32xf32> to vector<1x32xf32>
    %6 = vector.extract_strided_slice %4 {offsets = [1, 0], sizes = [1, 32], strides = [1, 1]} : vector<6x32xf32> to vector<1x32xf32>
    %7 = vector.extract_strided_slice %4 {offsets = [2, 0], sizes = [1, 32], strides = [1, 1]} : vector<6x32xf32> to vector<1x32xf32>
    %8 = vector.extract_strided_slice %4 {offsets = [3, 0], sizes = [1, 32], strides = [1, 1]} : vector<6x32xf32> to vector<1x32xf32>
    %9 = vector.extract_strided_slice %4 {offsets = [4, 0], sizes = [1, 32], strides = [1, 1]} : vector<6x32xf32> to vector<1x32xf32>
    %10 = vector.extract_strided_slice %4 {offsets = [5, 0], sizes = [1, 32], strides = [1, 1]} : vector<6x32xf32> to vector<1x32xf32>
    %c0_3 = arith.constant 0 : index
    %c0_4 = arith.constant 0 : index
    %c0_5 = arith.constant 0 : index
    %11 = vector.load %arg7[%c0_3, %c0_4, %c0_5] : memref<1x1x160xf32, #tpu.memory_space<vmem>>, vector<1x1x160xf32>
    %12 = vector.shape_cast %11 : vector<1x1x160xf32> to vector<1x160xf32>
    %13 = vector.extract_strided_slice %12 {offsets = [0, 0], sizes = [1, 96], strides = [1, 1]} : vector<1x160xf32> to vector<1x96xf32>
    %14 = vector.extract_strided_slice %12 {offsets = [0, 96], sizes = [1, 64], strides = [1, 1]} : vector<1x160xf32> to vector<1x64xf32>
    %c0_6 = arith.constant 0 : index
    %c0_7 = arith.constant 0 : index
    %15 = vector.load %arg14[%c0_6, %c0_7] : memref<32x32xf32, #tpu.memory_space<vmem>>, vector<32x32xf32>
    %cst = arith.constant dense<0.000000e+00> : vector<32xf32>
    %16 = vector.multi_reduction <add>, %15, %cst [1] : vector<32x32xf32> to vector<32xf32>
    %17 = vector.shape_cast %16 : vector<32xf32> to vector<32x1xf32>
    %cst_8 = arith.constant 3.200000e+01 : f32
    %18 = vector.broadcast %cst_8 : f32 to vector<32x1xf32>
    %19 = arith.divf %17, %18 : vector<32x1xf32>
    %20 = vector.broadcast %19 : vector<32x1xf32> to vector<32x32xf32>
    %21 = arith.subf %15, %20 : vector<32x32xf32>
    %22 = arith.mulf %21, %21 : vector<32x32xf32>
    %cst_9 = arith.constant dense<0.000000e+00> : vector<32xf32>
    %23 = vector.multi_reduction <add>, %22, %cst_9 [1] : vector<32x32xf32> to vector<32xf32>
    %24 = vector.shape_cast %23 : vector<32xf32> to vector<32x1xf32>
    %cst_10 = arith.constant 3.200000e+01 : f32
    %25 = vector.broadcast %cst_10 : f32 to vector<32x1xf32>
    %26 = arith.divf %24, %25 : vector<32x1xf32>
    %27 = vector.broadcast %19 : vector<32x1xf32> to vector<32x32xf32>
    %28 = arith.subf %15, %27 : vector<32x32xf32>
    %cst_11 = arith.constant 9.99999974E-6 : f32
    %29 = vector.broadcast %cst_11 : f32 to vector<32x1xf32>
    %30 = arith.addf %26, %29 : vector<32x1xf32>
    %31 = math.rsqrt %30 : vector<32x1xf32>
    %32 = vector.broadcast %31 : vector<32x1xf32> to vector<32x32xf32>
    %33 = arith.mulf %28, %32 : vector<32x32xf32>
    %34 = vector.broadcast %5 : vector<1x32xf32> to vector<32x32xf32>
    %35 = arith.mulf %33, %34 : vector<32x32xf32>
    %36 = vector.broadcast %6 : vector<1x32xf32> to vector<32x32xf32>
    %37 = arith.addf %35, %36 : vector<32x32xf32>
    %38 = arith.truncf %37 : vector<32x32xf32> to vector<32x32xbf16>
    %c0_12 = arith.constant 0 : index
    %c0_13 = arith.constant 0 : index
    %c0_14 = arith.constant 0 : index
    %39 = vector.load %arg6[%c0_12, %c0_13, %c0_14] : memref<1x32x96xbf16, #tpu.memory_space<vmem>>, vector<1x32x96xbf16>
    %40 = vector.shape_cast %39 : vector<1x32x96xbf16> to vector<32x96xbf16>
    %cst_15 = arith.constant dense<0.000000e+00> : vector<32x96xf32>
    %41 = tpu.matmul %38, %40, %cst_15 {dimension_numbers = #tpu.dot_dimension_numbers<[1], [0], [0], [1], [0, 0, 1, 1], [], []>} : vector<32x32xbf16>, vector<32x96xbf16>, vector<32x96xf32> -> vector<32x96xf32>
    %42 = vector.broadcast %13 : vector<1x96xf32> to vector<32x96xf32>
    %43 = arith.addf %41, %42 : vector<32x96xf32>
    %44 = arith.truncf %43 : vector<32x96xf32> to vector<32x96xbf16>
    %45 = vector.extract_strided_slice %44 {offsets = [0, 0], sizes = [32, 8], strides = [1, 1]} : vector<32x96xbf16> to vector<32x8xbf16>
    %46 = vector.shape_cast %45 : vector<32x8xbf16> to vector<2x16x8xbf16>
    %47 = vector.extract_strided_slice %44 {offsets = [0, 32], sizes = [32, 8], strides = [1, 1]} : vector<32x96xbf16> to vector<32x8xbf16>
    %48 = vector.shape_cast %47 : vector<32x8xbf16> to vector<2x16x8xbf16>
    %49 = vector.extract_strided_slice %44 {offsets = [0, 64], sizes = [32, 8], strides = [1, 1]} : vector<32x96xbf16> to vector<32x8xbf16>
    %50 = vector.shape_cast %49 : vector<32x8xbf16> to vector<2x16x8xbf16>
    %cst_16 = arith.constant dense<0.000000e+00> : vector<2x16x16xf32>
    %51 = tpu.matmul %46, %48, %cst_16 {dimension_numbers = #tpu.dot_dimension_numbers<[2], [2], [1], [1], [0, 0, 0, 1, 1, 1], [0], [0]>} : vector<2x16x8xbf16>, vector<2x16x8xbf16>, vector<2x16x16xf32> -> vector<2x16x16xf32>
    %cst_17 = arith.constant dense<0xFF800000> : vector<2x16xf32>
    %52 = vector.multi_reduction <maximumf>, %51, %cst_17 [2] : vector<2x16x16xf32> to vector<2x16xf32>
    %53 = vector.shape_cast %52 : vector<2x16xf32> to vector<2x16x1xf32>
    %54 = vector.broadcast %53 : vector<2x16x1xf32> to vector<2x16x16xf32>
    %55 = arith.subf %51, %54 : vector<2x16x16xf32>
    %56 = math.exp %55 : vector<2x16x16xf32>
    %cst_18 = arith.constant dense<0.000000e+00> : vector<2x16xf32>
    %57 = vector.multi_reduction <add>, %56, %cst_18 [2] : vector<2x16x16xf32> to vector<2x16xf32>
    %58 = vector.shape_cast %57 : vector<2x16xf32> to vector<2x16x1xf32>
    %59 = tpu.reciprocal %58 {approx = true} : vector<2x16x1xf32> -> vector<2x16x1xf32>
    %60 = vector.broadcast %59 : vector<2x16x1xf32> to vector<2x16x16xf32>
    %61 = arith.mulf %56, %60 : vector<2x16x16xf32>
    %62 = arith.truncf %61 : vector<2x16x16xf32> to vector<2x16x16xbf16>
    %cst_19 = arith.constant dense<0.000000e+00> : vector<2x16x8xf32>
    %63 = tpu.matmul %62, %50, %cst_19 {dimension_numbers = #tpu.dot_dimension_numbers<[2], [1], [1], [2], [0, 0, 0, 1, 1, 2], [0], [0]>} : vector<2x16x16xbf16>, vector<2x16x8xbf16>, vector<2x16x8xf32> -> vector<2x16x8xf32>
    %64 = vector.shape_cast %63 : vector<2x16x8xf32> to vector<32x8xf32>
    %65 = arith.truncf %64 : vector<32x8xf32> to vector<32x8xbf16>
    %c0_20 = arith.constant 0 : index
    %c0_21 = arith.constant 0 : index
    %66 = vector.load %arg15[%c0_20, %c0_21] : memref<32x32xbf16, #tpu.memory_space<vmem>>, vector<32x8xbf16>
    tpu.vector_store %arg15[%c0_20, %c0_21], %65 {strides = array<i32>} : memref<32x32xbf16, #tpu.memory_space<vmem>>, vector<32x8xbf16>,
    %67 = vector.extract_strided_slice %44 {offsets = [0, 8], sizes = [32, 8], strides = [1, 1]} : vector<32x96xbf16> to vector<32x8xbf16>
    %68 = vector.shape_cast %67 : vector<32x8xbf16> to vector<2x16x8xbf16>
    %69 = vector.extract_strided_slice %44 {offsets = [0, 40], sizes = [32, 8], strides = [1, 1]} : vector<32x96xbf16> to vector<32x8xbf16>
    %70 = vector.shape_cast %69 : vector<32x8xbf16> to vector<2x16x8xbf16>
    %71 = vector.extract_strided_slice %44 {offsets = [0, 72], sizes = [32, 8], strides = [1, 1]} : vector<32x96xbf16> to vector<32x8xbf16>
    %72 = vector.shape_cast %71 : vector<32x8xbf16> to vector<2x16x8xbf16>
    %cst_22 = arith.constant dense<0.000000e+00> : vector<2x16x16xf32>
    %73 = tpu.matmul %68, %70, %cst_22 {dimension_numbers = #tpu.dot_dimension_numbers<[2], [2], [1], [1], [0, 0, 0, 1, 1, 1], [0], [0]>} : vector<2x16x8xbf16>, vector<2x16x8xbf16>, vector<2x16x16xf32> -> vector<2x16x16xf32>
    %cst_23 = arith.constant dense<0xFF800000> : vector<2x16xf32>
    %74 = vector.multi_reduction <maximumf>, %73, %cst_23 [2] : vector<2x16x16xf32> to vector<2x16xf32>
    %75 = vector.shape_cast %74 : vector<2x16xf32> to vector<2x16x1xf32>
    %76 = vector.broadcast %75 : vector<2x16x1xf32> to vector<2x16x16xf32>
    %77 = arith.subf %73, %76 : vector<2x16x16xf32>
    %78 = math.exp %77 : vector<2x16x16xf32>
    %cst_24 = arith.constant dense<0.000000e+00> : vector<2x16xf32>
    %79 = vector.multi_reduction <add>, %78, %cst_24 [2] : vector<2x16x16xf32> to vector<2x16xf32>
    %80 = vector.shape_cast %79 : vector<2x16xf32> to vector<2x16x1xf32>
    %81 = tpu.reciprocal %80 {approx = true} : vector<2x16x1xf32> -> vector<2x16x1xf32>
    %82 = vector.broadcast %81 : vector<2x16x1xf32> to vector<2x16x16xf32>
    %83 = arith.mulf %78, %82 : vector<2x16x16xf32>
    %84 = arith.truncf %83 : vector<2x16x16xf32> to vector<2x16x16xbf16>
    %cst_25 = arith.constant dense<0.000000e+00> : vector<2x16x8xf32>
    %85 = tpu.matmul %84, %72, %cst_25 {dimension_numbers = #tpu.dot_dimension_numbers<[2], [1], [1], [2], [0, 0, 0, 1, 1, 2], [0], [0]>} : vector<2x16x16xbf16>, vector<2x16x8xbf16>, vector<2x16x8xf32> -> vector<2x16x8xf32>
    %86 = vector.shape_cast %85 : vector<2x16x8xf32> to vector<32x8xf32>
    %87 = arith.truncf %86 : vector<32x8xf32> to vector<32x8xbf16>
    %c0_26 = arith.constant 0 : index
    %c8 = arith.constant 8 : index
    %88 = vector.load %arg15[%c0_26, %c8] : memref<32x32xbf16, #tpu.memory_space<vmem>>, vector<32x8xbf16>
    tpu.vector_store %arg15[%c0_26, %c8], %87 {strides = array<i32>} : memref<32x32xbf16, #tpu.memory_space<vmem>>, vector<32x8xbf16>,
    %89 = vector.extract_strided_slice %44 {offsets = [0, 16], sizes = [32, 8], strides = [1, 1]} : vector<32x96xbf16> to vector<32x8xbf16>
    %90 = vector.shape_cast %89 : vector<32x8xbf16> to vector<2x16x8xbf16>
    %91 = vector.extract_strided_slice %44 {offsets = [0, 48], sizes = [32, 8], strides = [1, 1]} : vector<32x96xbf16> to vector<32x8xbf16>
    %92 = vector.shape_cast %91 : vector<32x8xbf16> to vector<2x16x8xbf16>
    %93 = vector.extract_strided_slice %44 {offsets = [0, 80], sizes = [32, 8], strides = [1, 1]} : vector<32x96xbf16> to vector<32x8xbf16>
    %94 = vector.shape_cast %93 : vector<32x8xbf16> to vector<2x16x8xbf16>
    %cst_27 = arith.constant dense<0.000000e+00> : vector<2x16x16xf32>
    %95 = tpu.matmul %90, %92, %cst_27 {dimension_numbers = #tpu.dot_dimension_numbers<[2], [2], [1], [1], [0, 0, 0, 1, 1, 1], [0], [0]>} : vector<2x16x8xbf16>, vector<2x16x8xbf16>, vector<2x16x16xf32> -> vector<2x16x16xf32>
    %cst_28 = arith.constant dense<0xFF800000> : vector<2x16xf32>
    %96 = vector.multi_reduction <maximumf>, %95, %cst_28 [2] : vector<2x16x16xf32> to vector<2x16xf32>
    %97 = vector.shape_cast %96 : vector<2x16xf32> to vector<2x16x1xf32>
    %98 = vector.broadcast %97 : vector<2x16x1xf32> to vector<2x16x16xf32>
    %99 = arith.subf %95, %98 : vector<2x16x16xf32>
    %100 = math.exp %99 : vector<2x16x16xf32>
    %cst_29 = arith.constant dense<0.000000e+00> : vector<2x16xf32>
    %101 = vector.multi_reduction <add>, %100, %cst_29 [2] : vector<2x16x16xf32> to vector<2x16xf32>
    %102 = vector.shape_cast %101 : vector<2x16xf32> to vector<2x16x1xf32>
    %103 = tpu.reciprocal %102 {approx = true} : vector<2x16x1xf32> -> vector<2x16x1xf32>
    %104 = vector.broadcast %103 : vector<2x16x1xf32> to vector<2x16x16xf32>
    %105 = arith.mulf %100, %104 : vector<2x16x16xf32>
    %106 = arith.truncf %105 : vector<2x16x16xf32> to vector<2x16x16xbf16>
    %cst_30 = arith.constant dense<0.000000e+00> : vector<2x16x8xf32>
    %107 = tpu.matmul %106, %94, %cst_30 {dimension_numbers = #tpu.dot_dimension_numbers<[2], [1], [1], [2], [0, 0, 0, 1, 1, 2], [0], [0]>} : vector<2x16x16xbf16>, vector<2x16x8xbf16>, vector<2x16x8xf32> -> vector<2x16x8xf32>
    %108 = vector.shape_cast %107 : vector<2x16x8xf32> to vector<32x8xf32>
    %109 = arith.truncf %108 : vector<32x8xf32> to vector<32x8xbf16>
    %c0_31 = arith.constant 0 : index
    %c16 = arith.constant 16 : index
    %110 = vector.load %arg15[%c0_31, %c16] : memref<32x32xbf16, #tpu.memory_space<vmem>>, vector<32x8xbf16>
    tpu.vector_store %arg15[%c0_31, %c16], %109 {strides = array<i32>} : memref<32x32xbf16, #tpu.memory_space<vmem>>, vector<32x8xbf16>,
    %111 = vector.extract_strided_slice %44 {offsets = [0, 24], sizes = [32, 8], strides = [1, 1]} : vector<32x96xbf16> to vector<32x8xbf16>
    %112 = vector.shape_cast %111 : vector<32x8xbf16> to vector<2x16x8xbf16>
    %113 = vector.extract_strided_slice %44 {offsets = [0, 56], sizes = [32, 8], strides = [1, 1]} : vector<32x96xbf16> to vector<32x8xbf16>
    %114 = vector.shape_cast %113 : vector<32x8xbf16> to vector<2x16x8xbf16>
    %115 = vector.extract_strided_slice %44 {offsets = [0, 88], sizes = [32, 8], strides = [1, 1]} : vector<32x96xbf16> to vector<32x8xbf16>
    %116 = vector.shape_cast %115 : vector<32x8xbf16> to vector<2x16x8xbf16>
    %cst_32 = arith.constant dense<0.000000e+00> : vector<2x16x16xf32>
    %117 = tpu.matmul %112, %114, %cst_32 {dimension_numbers = #tpu.dot_dimension_numbers<[2], [2], [1], [1], [0, 0, 0, 1, 1, 1], [0], [0]>} : vector<2x16x8xbf16>, vector<2x16x8xbf16>, vector<2x16x16xf32> -> vector<2x16x16xf32>
    %cst_33 = arith.constant dense<0xFF800000> : vector<2x16xf32>
    %118 = vector.multi_reduction <maximumf>, %117, %cst_33 [2] : vector<2x16x16xf32> to vector<2x16xf32>
    %119 = vector.shape_cast %118 : vector<2x16xf32> to vector<2x16x1xf32>
    %120 = vector.broadcast %119 : vector<2x16x1xf32> to vector<2x16x16xf32>
    %121 = arith.subf %117, %120 : vector<2x16x16xf32>
    %122 = math.exp %121 : vector<2x16x16xf32>
    %cst_34 = arith.constant dense<0.000000e+00> : vector<2x16xf32>
    %123 = vector.multi_reduction <add>, %122, %cst_34 [2] : vector<2x16x16xf32> to vector<2x16xf32>
    %124 = vector.shape_cast %123 : vector<2x16xf32> to vector<2x16x1xf32>
    %125 = tpu.reciprocal %124 {approx = true} : vector<2x16x1xf32> -> vector<2x16x1xf32>
    %126 = vector.broadcast %125 : vector<2x16x1xf32> to vector<2x16x16xf32>
    %127 = arith.mulf %122, %126 : vector<2x16x16xf32>
    %128 = arith.truncf %127 : vector<2x16x16xf32> to vector<2x16x16xbf16>
    %cst_35 = arith.constant dense<0.000000e+00> : vector<2x16x8xf32>
    %129 = tpu.matmul %128, %116, %cst_35 {dimension_numbers = #tpu.dot_dimension_numbers<[2], [1], [1], [2], [0, 0, 0, 1, 1, 2], [0], [0]>} : vector<2x16x16xbf16>, vector<2x16x8xbf16>, vector<2x16x8xf32> -> vector<2x16x8xf32>
    %130 = vector.shape_cast %129 : vector<2x16x8xf32> to vector<32x8xf32>
    %131 = arith.truncf %130 : vector<32x8xf32> to vector<32x8xbf16>
    %c0_36 = arith.constant 0 : index
    %c24 = arith.constant 24 : index
    %132 = vector.load %arg15[%c0_36, %c24] : memref<32x32xbf16, #tpu.memory_space<vmem>>, vector<32x8xbf16>
    tpu.vector_store %arg15[%c0_36, %c24], %131 {strides = array<i32>} : memref<32x32xbf16, #tpu.memory_space<vmem>>, vector<32x8xbf16>,
    %c0_37 = arith.constant 0 : index
    %c0_38 = arith.constant 0 : index
    %133 = vector.load %arg15[%c0_37, %c0_38] : memref<32x32xbf16, #tpu.memory_space<vmem>>, vector<32x32xbf16>
    %c0_39 = arith.constant 0 : index
    %c0_40 = arith.constant 0 : index
    %c0_41 = arith.constant 0 : index
    %134 = vector.load %arg8[%c0_39, %c0_40, %c0_41] : memref<1x32x32xbf16, #tpu.memory_space<vmem>>, vector<1x32x32xbf16>
    %135 = vector.shape_cast %134 : vector<1x32x32xbf16> to vector<32x32xbf16>
    %cst_42 = arith.constant dense<0.000000e+00> : vector<32x32xf32>
    %136 = tpu.matmul %133, %135, %cst_42 {dimension_numbers = #tpu.dot_dimension_numbers<[1], [0], [0], [1], [0, 0, 1, 1], [], []>} : vector<32x32xbf16>, vector<32x32xbf16>, vector<32x32xf32> -> vector<32x32xf32>
    %137 = arith.addf %15, %136 : vector<32x32xf32>
    %138 = vector.broadcast %7 : vector<1x32xf32> to vector<32x32xf32>
    %139 = arith.addf %137, %138 : vector<32x32xf32>
    %cst_43 = arith.constant dense<0.000000e+00> : vector<32xf32>
    %140 = vector.multi_reduction <add>, %139, %cst_43 [1] : vector<32x32xf32> to vector<32xf32>
    %141 = vector.shape_cast %140 : vector<32xf32> to vector<32x1xf32>
    %cst_44 = arith.constant 3.200000e+01 : f32
    %142 = vector.broadcast %cst_44 : f32 to vector<32x1xf32>
    %143 = arith.divf %141, %142 : vector<32x1xf32>
    %144 = vector.broadcast %143 : vector<32x1xf32> to vector<32x32xf32>
    %145 = arith.subf %139, %144 : vector<32x32xf32>
    %146 = arith.mulf %145, %145 : vector<32x32xf32>
    %cst_45 = arith.constant dense<0.000000e+00> : vector<32xf32>
    %147 = vector.multi_reduction <add>, %146, %cst_45 [1] : vector<32x32xf32> to vector<32xf32>
    %148 = vector.shape_cast %147 : vector<32xf32> to vector<32x1xf32>
    %cst_46 = arith.constant 3.200000e+01 : f32
    %149 = vector.broadcast %cst_46 : f32 to vector<32x1xf32>
    %150 = arith.divf %148, %149 : vector<32x1xf32>
    %151 = vector.broadcast %143 : vector<32x1xf32> to vector<32x32xf32>
    %152 = arith.subf %139, %151 : vector<32x32xf32>
    %cst_47 = arith.constant 9.99999974E-6 : f32
    %153 = vector.broadcast %cst_47 : f32 to vector<32x1xf32>
    %154 = arith.addf %150, %153 : vector<32x1xf32>
    %155 = math.rsqrt %154 : vector<32x1xf32>
    %156 = vector.broadcast %155 : vector<32x1xf32> to vector<32x32xf32>
    %157 = arith.mulf %152, %156 : vector<32x32xf32>
    %158 = vector.broadcast %8 : vector<1x32xf32> to vector<32x32xf32>
    %159 = arith.mulf %157, %158 : vector<32x32xf32>
    %160 = vector.broadcast %9 : vector<1x32xf32> to vector<32x32xf32>
    %161 = arith.addf %159, %160 : vector<32x32xf32>
    %162 = arith.truncf %161 : vector<32x32xf32> to vector<32x32xbf16>
    %cst_48 = arith.constant 0.000000e+00 : f32
    %163 = vector.broadcast %cst_48 : f32 to vector<32x32xf32>
    %c0_49 = arith.constant 0 : index
    %c0_50 = arith.constant 0 : index
    %c0_51 = arith.constant 0 : index
    %164 = vector.load %arg9[%c0_49, %c0_50, %c0_51] : memref<1x32x64xbf16, #tpu.memory_space<vmem>>, vector<1x32x64xbf16>
    %165 = vector.shape_cast %164 : vector<1x32x64xbf16> to vector<32x64xbf16>
    %cst_52 = arith.constant dense<0.000000e+00> : vector<32x64xf32>
    %166 = tpu.matmul %162, %165, %cst_52 {dimension_numbers = #tpu.dot_dimension_numbers<[1], [0], [0], [1], [0, 0, 1, 1], [], []>} : vector<32x32xbf16>, vector<32x64xbf16>, vector<32x64xf32> -> vector<32x64xf32>
    %167 = vector.broadcast %14 : vector<1x64xf32> to vector<32x64xf32>
    %168 = arith.addf %166, %167 : vector<32x64xf32>
    %cst_53 = arith.constant 5.000000e-01 : f32
    %169 = vector.broadcast %cst_53 : f32 to vector<32x64xf32>
    %170 = arith.mulf %169, %168 : vector<32x64xf32>
    %cst_54 = arith.constant 0.707106769 : f32
    %171 = vector.broadcast %cst_54 : f32 to vector<32x64xf32>
    %172 = arith.mulf %168, %171 : vector<32x64xf32>
    %173 = math.absf %172 : vector<32x64xf32>
    %cst_55 = arith.constant 0.327591091 : f32
    %174 = vector.broadcast %cst_55 : f32 to vector<32x64xf32>
    %175 = arith.mulf %174, %173 : vector<32x64xf32>
    %cst_56 = arith.constant 1.000000e+00 : f32
    %176 = vector.broadcast %cst_56 : f32 to vector<32x64xf32>
    %177 = arith.addf %176, %175 : vector<32x64xf32>
    %178 = tpu.reciprocal %177 {approx = true} : vector<32x64xf32> -> vector<32x64xf32>
    %179 = arith.mulf %177, %178 : vector<32x64xf32>
    %cst_57 = arith.constant 2.000000e+00 : f32
    %180 = vector.broadcast %cst_57 : f32 to vector<32x64xf32>
    %181 = arith.subf %180, %179 : vector<32x64xf32>
    %182 = arith.mulf %178, %181 : vector<32x64xf32>
    %cst_58 = arith.constant 1.06140542 : f32
    %183 = vector.broadcast %cst_58 : f32 to vector<32x64xf32>
    %184 = arith.mulf %183, %182 : vector<32x64xf32>
    %cst_59 = arith.constant -1.45315206 : f32
    %185 = vector.broadcast %cst_59 : f32 to vector<32x64xf32>
    %186 = arith.addf %184, %185 : vector<32x64xf32>
    %187 = arith.mulf %186, %182 : vector<32x64xf32>
    %cst_60 = arith.constant 1.42141378 : f32
    %188 = vector.broadcast %cst_60 : f32 to vector<32x64xf32>
    %189 = arith.addf %187, %188 : vector<32x64xf32>
    %190 = arith.mulf %189, %182 : vector<32x64xf32>
    %cst_61 = arith.constant -0.284496725 : f32
    %191 = vector.broadcast %cst_61 : f32 to vector<32x64xf32>
    %192 = arith.addf %190, %191 : vector<32x64xf32>
    %193 = arith.mulf %192, %182 : vector<32x64xf32>
    %cst_62 = arith.constant 0.254829586 : f32
    %194 = vector.broadcast %cst_62 : f32 to vector<32x64xf32>
    %195 = arith.addf %193, %194 : vector<32x64xf32>
    %196 = arith.mulf %195, %182 : vector<32x64xf32>
    %cst_63 = arith.constant 0.000000e+00 : f32
    %197 = vector.broadcast %cst_63 : f32 to vector<32x64xf32>
    %198 = arith.subf %197, %173 : vector<32x64xf32>
    %199 = arith.mulf %198, %173 : vector<32x64xf32>
    %200 = math.exp %199 : vector<32x64xf32>
    %201 = arith.mulf %196, %200 : vector<32x64xf32>
    %cst_64 = arith.constant 1.000000e+00 : f32
    %202 = vector.broadcast %cst_64 : f32 to vector<32x64xf32>
    %203 = arith.subf %202, %201 : vector<32x64xf32>
    %cst_65 = arith.constant 0.000000e+00 : f32
    %204 = vector.broadcast %cst_65 : f32 to vector<32x64xf32>
    %205 = arith.cmpf olt, %172, %204 : vector<32x64xf32>
    %cst_66 = arith.constant 0.000000e+00 : f32
    %206 = vector.broadcast %cst_66 : f32 to vector<32x64xf32>
    %207 = arith.subf %206, %203 : vector<32x64xf32>
    %208 = arith.select %205, %207, %203 : vector<32x64xi1>, vector<32x64xf32>
    %cst_67 = arith.constant 1.000000e+00 : f32
    %209 = vector.broadcast %cst_67 : f32 to vector<32x64xf32>
    %210 = arith.addf %209, %208 : vector<32x64xf32>
    %211 = arith.mulf %170, %210 : vector<32x64xf32>
    %212 = arith.truncf %211 : vector<32x64xf32> to vector<32x64xbf16>
    %c0_68 = arith.constant 0 : index
    %c0_69 = arith.constant 0 : index
    %c0_70 = arith.constant 0 : index
    %213 = vector.load %arg10[%c0_68, %c0_69, %c0_70] : memref<1x64x32xbf16, #tpu.memory_space<vmem>>, vector<1x64x32xbf16>
    %214 = vector.shape_cast %213 : vector<1x64x32xbf16> to vector<64x32xbf16>
    %cst_71 = arith.constant dense<0.000000e+00> : vector<32x32xf32>
    %215 = tpu.matmul %212, %214, %cst_71 {dimension_numbers = #tpu.dot_dimension_numbers<[1], [0], [0], [1], [0, 0, 1, 1], [], []>} : vector<32x64xbf16>, vector<64x32xbf16>, vector<32x32xf32> -> vector<32x32xf32>
    %216 = arith.addf %163, %215 : vector<32x32xf32>
    %217 = arith.addf %139, %216 : vector<32x32xf32>
    %218 = vector.broadcast %10 : vector<1x32xf32> to vector<32x32xf32>
    %219 = arith.addf %217, %218 : vector<32x32xf32>
    %c0_72 = arith.constant 0 : index
    %c0_73 = arith.constant 0 : index
    %220 = vector.load %arg14[%c0_72, %c0_73] : memref<32x32xf32, #tpu.memory_space<vmem>>, vector<32x32xf32>
    tpu.vector_store %arg14[%c0_72, %c0_73], %219 {strides = array<i32>} : memref<32x32xf32, #tpu.memory_space<vmem>>, vector<32x32xf32>,
    %c1_i32 = arith.constant 1 : i32
    %221 = arith.cmpi eq, %arg1, %c1_i32 : i32
    %222 = arith.extui %221 : i1 to i32
    %c0_i32_74 = arith.constant 0 : i32
    %223 = arith.cmpi ne, %222, %c0_i32_74 : i32
    scf.if %223 {
      %c0_75 = arith.constant 0 : index
      %c0_76 = arith.constant 0 : index
      %224 = vector.load %arg14[%c0_75, %c0_76] : memref<32x32xf32, #tpu.memory_space<vmem>>, vector<32x32xf32>
      %225 = vector.shape_cast %224 : vector<32x32xf32> to vector<2x16x32xf32>
      %cst_77 = arith.constant dense<0.000000e+00> : vector<2x32xf32>
      %226 = vector.multi_reduction <add>, %225, %cst_77 [1] : vector<2x16x32xf32> to vector<2x32xf32>
      %cst_78 = arith.constant 1.600000e+01 : f32
      %227 = vector.broadcast %cst_78 : f32 to vector<2x32xf32>
      %228 = arith.divf %226, %227 : vector<2x32xf32>
      %229 = arith.truncf %228 : vector<2x32xf32> to vector<2x32xbf16>
      %c0_79 = arith.constant 0 : index
      %c0_80 = arith.constant 0 : index
      %230 = vector.load %arg11[%c0_79, %c0_80] : memref<32x128xbf16, #tpu.memory_space<vmem>>, vector<32x128xbf16>
      %cst_81 = arith.constant dense<0.000000e+00> : vector<2x128xf32>
      %231 = tpu.matmul %229, %230, %cst_81 {dimension_numbers = #tpu.dot_dimension_numbers<[1], [0], [0], [1], [0, 0, 1, 1], [], []>} : vector<2x32xbf16>, vector<32x128xbf16>, vector<2x128xf32> -> vector<2x128xf32>
      %c0_82 = arith.constant 0 : index
      %c0_83 = arith.constant 0 : index
      %232 = vector.load %arg12[%c0_82, %c0_83] : memref<1x128xf32, #tpu.memory_space<vmem>>, vector<1x128xf32>
      %233 = vector.broadcast %232 : vector<1x128xf32> to vector<2x128xf32>
      %234 = arith.addf %231, %233 : vector<2x128xf32>
      %c0_84 = arith.constant 0 : index
      %c0_85 = arith.constant 0 : index
      %235 = vector.load %arg13[%c0_84, %c0_85] : memref<2x128xf32, #tpu.memory_space<vmem>>, vector<2x128xf32>
      tpu.vector_store %arg13[%c0_84, %c0_85], %234 {strides = array<i32>} : memref<2x128xf32, #tpu.memory_space<vmem>>, vector<2x128xf32>,
    } else {
    }
    return
  }
  func.func @transform_0(%arg0: i32, %arg1: i32) -> (i32, i32) {
    %c0_i32 = arith.constant 0 : i32
    %c0_i32_0 = arith.constant 0 : i32
    return %arg0, %c0_i32 : i32, i32
  }
  func.func @transform_1(%arg0: i32, %arg1: i32) -> (i32, i32) {
    %c0_i32 = arith.constant 0 : i32
    %c0_i32_0 = arith.constant 0 : i32
    %c0_i32_1 = arith.constant 0 : i32
    return %c0_i32, %c0_i32_0 : i32, i32
  }
  func.func @transform_2(%arg0: i32, %arg1: i32) -> (i32, i32) {
    %c0_i32 = arith.constant 0 : i32
    %c0_i32_0 = arith.constant 0 : i32
    %c0_i32_1 = arith.constant 0 : i32
    return %c0_i32, %c0_i32_0 : i32, i32
  }
  func.func @transform_3(%arg0: i32, %arg1: i32) -> (i32, i32, i32) {
    %c0_i32 = arith.constant 0 : i32
    %c0_i32_0 = arith.constant 0 : i32
    %c0_i32_1 = arith.constant 0 : i32
    return %arg1, %c0_i32, %c0_i32_0 : i32, i32, i32
  }
  func.func @transform_4(%arg0: i32, %arg1: i32) -> (i32, i32, i32) {
    %c0_i32 = arith.constant 0 : i32
    %c0_i32_0 = arith.constant 0 : i32
    %c0_i32_1 = arith.constant 0 : i32
    return %arg1, %c0_i32, %c0_i32_0 : i32, i32, i32
  }
  func.func @transform_5(%arg0: i32, %arg1: i32) -> (i32, i32, i32) {
    %c0_i32 = arith.constant 0 : i32
    %c0_i32_0 = arith.constant 0 : i32
    %c0_i32_1 = arith.constant 0 : i32
    return %arg1, %c0_i32, %c0_i32_0 : i32, i32, i32
  }
  func.func @transform_6(%arg0: i32, %arg1: i32) -> (i32, i32, i32) {
    %c0_i32 = arith.constant 0 : i32
    %c0_i32_0 = arith.constant 0 : i32
    %c0_i32_1 = arith.constant 0 : i32
    return %arg1, %c0_i32, %c0_i32_0 : i32, i32, i32
  }
  func.func @transform_7(%arg0: i32, %arg1: i32) -> (i32, i32, i32) {
    %c0_i32 = arith.constant 0 : i32
    %c0_i32_0 = arith.constant 0 : i32
    %c0_i32_1 = arith.constant 0 : i32
    return %arg1, %c0_i32, %c0_i32_0 : i32, i32, i32
  }
  func.func @transform_8(%arg0: i32, %arg1: i32) -> (i32, i32, i32) {
    %c0_i32 = arith.constant 0 : i32
    %c0_i32_0 = arith.constant 0 : i32
    %c0_i32_1 = arith.constant 0 : i32
    return %arg1, %c0_i32, %c0_i32_0 : i32, i32, i32
  }
  func.func @transform_9(%arg0: i32, %arg1: i32) -> (i32, i32) {
    %c0_i32 = arith.constant 0 : i32
    %c0_i32_0 = arith.constant 0 : i32
    %c0_i32_1 = arith.constant 0 : i32
    return %c0_i32, %c0_i32_0 : i32, i32
  }
  func.func @transform_10(%arg0: i32, %arg1: i32) -> (i32, i32) {
    %c0_i32 = arith.constant 0 : i32
    %c0_i32_0 = arith.constant 0 : i32
    %c0_i32_1 = arith.constant 0 : i32
    return %c0_i32, %c0_i32_0 : i32, i32
  }
  func.func @transform_11(%arg0: i32, %arg1: i32) -> (i32, i32) {
    %c0_i32 = arith.constant 0 : i32
    %c0_i32_0 = arith.constant 0 : i32
    return %arg0, %c0_i32 : i32, i32
  }
}

</mosaic_0001>

<bundles_post_ra>
// kernel: vision_transformer_forward.1
= control target key start
LH: loop header
LB: loop body
LE: loop exit
PB: predicated region body
PF: predicated region fallthrough
CT: control target
= control target key end

     0   :  { %s2972_s0 = inlined_call_operand.vmem [shape: f32[32,64], index: 0, kind: input, shape index: {}]   ;;  %s2973_s1 = inlined_call_operand.vmem [shape: bf16[64,32], index: 1, kind: input, shape index: {}]   ;;  %s2974_s2 = inlined_call_operand.vmem [shape: f32[16,32], index: 2, kind: input, shape index: {}]   ;;  %s2975_s3 = inlined_call_operand.vmem [shape: f32[2,6,32], index: 3, kind: input, shape index: {}]   ;;  %s2976_s4 = inlined_call_operand.vmem [shape: bf16[2,32,96], index: 4, kind: input, shape index: {}]   ;;  %s2977_s5 = inlined_call_operand.vmem [shape: f32[2,1,160], index: 5, kind: input, shape index: {}]   ;;  %s2978_s6 = inlined_call_operand.vmem [shape: bf16[2,32,32], index: 6, kind: input, shape index: {}]   ;;  %s2979_s7 = inlined_call_operand.vmem [shape: bf16[2,32,64], index: 7, kind: input, shape index: {}]   ;;  %s2980_s8 = inlined_call_operand.vmem [shape: bf16[2,64,32], index: 8, kind: input, shape index: {}]   ;;  %s2981_s9 = inlined_call_operand.vmem [shape: bf16[32,128], index: 9, kind: input, shape index: {}]   ;;  %s2982_s10 = inlined_call_operand.vmem [shape: f32[1,128], index: 10, kind: input, shape index: {}]   ;;  %s2983_s11 = inlined_call_operand.hbm [shape: f32[2,128], index: 11, kind: output, shape index: {}]  }
   0x1   :  { %2985 = sst [smem:[#allocation9_spill]] %s2975_s3 }
   0x2   :  { %16 = vsyncpa [#allocation5], 0  ;;  %s2477_s17 = smov 0   ;;  %s2479_s18 = smov 0  }
   0x3   :  { %s2481_s19 = smov 0  }
   0x4 LB: > { %2986 = sst [smem:[#allocation7_spill]] %s2393_s18  ;;  %s31_s21 = sadd.s32 1, %s2393_s18  ;;  %s2397_s19 = sphi %s2481_s19, %s22_s19   ;;  %s2393_s18 = sphi %s2479_s18, %s2991_s18   ;;  %s2389_s17 = sphi %s2477_s17, %s2990_s17  }
   0x5   : > { %p32_p0 = scmp.ge.s32.totalorder %s31_s21, 2  ;;  %p2046_p1 = scmp.ge.s32.totalorder %s2397_s19, 1 }
   0x6   : > { %p409_p2 = scmp.lt.s32.totalorder %s2397_s19, 3 }
   0x7   : > { %s2993_s21 = smov (%p32_p0, %s31_s21), 0 }
   0x8   : > { %2987 = sst [smem:[#allocation8_spill]] %s2993_s21  ;;  %p410_p3 = pnand %p2046_p1, %p409_p2 }
   0x9   : > { %p478_p4 = scmp.lt.s32.totalorder (!%p410_p3), %s2389_s17, 1  ;;  %s2988_s3 = sld [smem:[#allocation9_spill]] (!%p410_p3) }
   0xa   : > { %413 = sbr.rel (%p410_p3) target bundleno = 2402 (0x962), region = 64  ;;  %p2057_p5 = scmp.ne.s32.totalorder (!%p410_p3), %s2389_s17, 0 }
   0xf   : > { %s479_s22 = scalar_select %p478_p4, %s2389_s17, 1 }
  0x11   : > { %s2047_s23 = sshll.u32 %s479_s22, 3  ;;  %s2162_s24 = sshll.u32 %s479_s22, 4 }
  0x12   : > { %s2503_s27 = scalar_lea.vmem %s2988_s3, %s2047_s23  ;;  %s2508_s30 = scalar_lea.vmem %s2976_s4, %s2162_s24 }
  0x13   : > { %s2050_s12 = sshll.u32 %s479_s22, 1  ;;  %s2513_s15 = scalar_lea.vmem %s2978_s6, %s2162_s24 }
  0x14   : > { %s2518_s21 = scalar_lea.vmem %s2977_s5, %s2050_s12  ;;  %s2523_s23 = scalar_lea.vmem %s2979_s7, %s2162_s24 }
  0x15   : > { %s2165_s26 = sshll.u32 %s479_s22, 5  ;;  %510 = sbr.rel (%p2057_p5) target bundleno = 180 (0xb4), region = 68 }
  0x16   : > { %s2528_s3 = scalar_lea.vmem %s2980_s8, %s2165_s26 }
  0x1a   : > { %v2169_v0 = vld [vmem:[%s2973_s1 + $0x18] sm:$0xff]  ;;  %v2168_v1 = vld [vmem:[%s2973_s1 + $0x10] sm:$0xff]  ;;  %v2167_v2 = vld [vmem:[%s2973_s1 + $0x8] sm:$0xff]  ;;  %vm549_vm0 = vcmask 523264   ;;  %vm581_vm1 = vcmask 261120  }
  0x1b   : > { %560 = vmatpush.bf16.msra.mxu0 %v2169_v0  ;;  %2184 = vmatpush.bf16.msra.mxu1 %v2169_v0  ;;  %v2166_v3 = vld [vmem:[%s2973_s1] sm:$0xff]  ;;  %v512_v5 = vld [vmem:[%s2972_s0 + $0x8] sm:$0xff]  ;;  %v513_v6 = vld [vmem:[%s2972_s0 + $0x10] sm:$0xff] }
  0x1c   : > { %v511_v4 = vld [vmem:[%s2972_s0] sm:$0xff]  ;;  %v514_v7 = vld [vmem:[%s2972_s0 + $0x18] sm:$0xff]  ;;  %v576_v15 = vld [vmem:[%s2974_s2 + $0x8] sm:$0xff] }
  0x1d   : > { %v515_v8 = vpack.c.bf16 %v512_v5, %v511_v4  ;;  %v516_v9 = vpack.c.bf16 %v514_v7, %v513_v6  ;;  %v575_v10 = vld [vmem:[%s2974_s2] sm:$0xff] }
  0x1f   : > { %561 = vmatpush.bf16.msra.mxu0 %v2168_v1  ;;  %2185 = vmatpush.bf16.msra.mxu1 %v2168_v1 }
  0x23   : > { %562 = vmatpush.bf16.msra.mxu0 %v2167_v2  ;;  %2186 = vmatpush.bf16.msra.mxu1 %v2167_v2 }
  0x27   : > { %563 = vmatpush.bf16.msra.mxu0 %v2166_v3  ;;  %2187 = vmatpush.bf16.msra.mxu1 %v2166_v3 }
  0x2a   : > { %2074 = vmatmul.msk.bf16.vlgmr.msra.gmra.mxu0 %vm549_vm0, %v515_v8  ;;  %2075 = vmatmul.msk.bf16.vlgmr.msra.gmra.mxu1 %vm549_vm0, %v516_v9 }
  0xa7   : > { %v565_v11 = vpop.f32.mrf.mxu0  ;;  %v570_v12 = vpop.f32.mrf.mxu1 }
  0xa8   : > { %v577_v13 = vadd.f32 %v575_v10, %v565_v11  ;;  %v579_v14 = vadd.f32 %v575_v10, %v570_v12 }
  0xaa   : > { %582 = vst.msk [vmem:[#allocation2] sm:$0xff] %vm581_vm1, %v577_v13 }
  0xab   : > { %584 = vst.msk [vmem:[#allocation2 + $0x10] sm:$0xff] %vm581_vm1, %v579_v14 }
  0xaf   : > { %v567_v16 = vpop.f32.mrf.mxu0  ;;  %v572_v17 = vpop.f32.mrf.mxu1 }
  0xb0   : > { %v578_v18 = vadd.f32 %v576_v15, %v567_v16  ;;  %v580_v19 = vadd.f32 %v576_v15, %v572_v17 }
  0xb2   : > { %583 = vst.msk [vmem:[#allocation2 + $0x8] sm:$0xff] %vm581_vm1, %v578_v18 }
  0xb3   : > { %585 = vst.msk [vmem:[#allocation2 + $0x18] sm:$0xff] %vm581_vm1, %v580_v19 }
  0xb4 PF: > { %v590_v20 = vld [vmem:[#allocation2 + $0x10] sm:$0xff]  ;;  %vm592_vm2 = vcmask 261120   ;;  %v588_v21 = vld [vmem:[#allocation2] sm:$0xff]  ;;  %v2399_v28 = vmov 32.0   ;;  %v2171_v55 = vld [vmem:[%s2508_s30 + $0x8] sm:$0xff]  ;;  %s2401_s25 = smov 96  }
  0xb5   : > { %v599_v22 = vsel %vm592_vm2, %v590_v20, 0.0  ;;  %v593_v23 = vsel %vm592_vm2, %v588_v21, 0.0  ;;  %2236 = vrcp.f32 %v2399_v28  ;;  %731 = vmatpush.bf16.msra.mxu0 %v2171_v55  ;;  %v2170_v59 = vld [vmem:[%s2508_s30] sm:$0xff]  ;;  %s2400_s30 = smov 88   ;;  %s2402_s26 = smov 120   ;;  %vm755_vm0 = vcmask 64512  }
  0xb6   : > { %600 = vadd.xlane.f32.xlu1 %v599_v22  ;;  %594 = vadd.xlane.f32.xlu0 %v593_v23  ;;  %v2594_v22 = vld [vmem:[%s2503_s27] sm:$0x3f]  ;;  %s2403_s28 = smov 72   ;;  %s2404_s29 = smov 112   ;;  %vm803_vm1 = vcmask 130048  }
  0xb7   : > { %s2405_s13 = smov 80   ;;  %s2406_s14 = smov 56  }
  0xb8   : > { %s2407_s20 = smov 104   ;;  %s2408_s12 = smov 64  }
  0xb9   : > { %v589_v25 = vld [vmem:[#allocation2 + $0x8] sm:$0xff]  ;;  %732 = vmatpush.bf16.msra.mxu0 %v2170_v59  ;;  %s2409_s18 = smov 48   ;;  %s2410_s22 = smov 40  }
  0xba   : > { %v591_v24 = vld [vmem:[#allocation2 + $0x18] sm:$0xff]  ;;  %v596_v27 = vsel %vm592_vm2, %v589_v25, 0.0  ;;  %s2411_s24 = smov 8   ;;  %s2412_s16 = smov 16  }
  0xbb   : > { %v602_v26 = vsel %vm592_vm2, %v591_v24, 0.0  ;;  %v2237_v29 = vpop.eup %2236  ;;  %p2148_p6 = scmp.ne.s32.totalorder %s2389_s17, 1 }
  0xbc   : > { %v606_v30 = vmul.f32 32.0, %v2237_v29  ;;  %vm610_vm3 = vweird.f32 %v2237_v29 }
  0xbe   : > { %603 = vadd.xlane.f32.xlu1 %v602_v26  ;;  %597 = vadd.xlane.f32.xlu0 %v596_v27  ;;  %v607_v31 = vsub.f32 1.0, %v606_v30  ;;  %v688_v26 = vperm.slane %v2594_v22, 0 }
  0xc0   : > { %v608_v32 = vmul.f32 %v2237_v29, %v607_v31 }
  0xc2   : > { %v609_v33 = vadd.f32 %v2237_v29, %v608_v32 }
  0xc4   : > { %v2565_v34 = vsel %vm610_vm3, %v2237_v29, %v609_v33  ;;  %v693_v33 = vperm.slane %v2594_v22, 1  ;;  %vm906_vm3 = vcmask 60416  }
 0x129   : > { %v601_v35 = vpop.xlane.xlu1 %600  ;;  %v595_v36 = vpop.xlane.xlu0 %594 }
 0x12a   : > { %v614_v37 = vmul.f32 %v2565_v34, %v601_v35  ;;  %v612_v38 = vmul.f32 %v2565_v34, %v595_v36 }
 0x12c   : > { %v2569_v39 = vsub.f32 %v590_v20, %v614_v37  ;;  %v2571_v40 = vsub.f32 %v588_v21, %v612_v38 }
 0x12e   : > { %v622_v41 = vmul.f32 %v2569_v39, %v2569_v39  ;;  %v620_v42 = vmul.f32 %v2571_v40, %v2571_v40 }
 0x130   : > { %v630_v43 = vsel %vm592_vm2, %v622_v41, 0.0  ;;  %v624_v44 = vsel %vm592_vm2, %v620_v42, 0.0 }
 0x131   : > { %v604_v45 = vpop.xlane.xlu1 %603  ;;  %631 = vadd.xlane.f32.xlu0 %v630_v43  ;;  %625 = vadd.xlane.f32.xlu2 %v624_v44  ;;  %v598_v46 = vpop.xlane.xlu0 %597 }
 0x132   : > { %v615_v47 = vmul.f32 %v2565_v34, %v604_v45  ;;  %v613_v48 = vmul.f32 %v2565_v34, %v598_v46 }
 0x134   : > { %v2581_v49 = vsub.f32 %v591_v24, %v615_v47  ;;  %v617_v50 = vsub.f32 %v589_v25, %v613_v48 }
 0x136   : > { %v623_v51 = vmul.f32 %v2581_v49, %v2581_v49  ;;  %v621_v52 = vmul.f32 %v617_v50, %v617_v50 }
 0x138   : > { %v633_v53 = vsel %vm592_vm2, %v623_v51, 0.0  ;;  %v627_v54 = vsel %vm592_vm2, %v621_v52, 0.0 }
 0x139   : > { %634 = vadd.xlane.f32.xlu1 %v633_v53  ;;  %628 = vadd.xlane.f32.xlu2 %v627_v54  ;;  %v587_v53 = vld [vmem:[%s2518_s21] sm:$0x3] }
 0x13a   : > { %v2604_v55 = vperm.slane %v587_v53, 0 }
 0x1a4   : > { %v626_v56 = vpop.xlane.xlu2 %625  ;;  %v632_v58 = vpop.xlane.xlu0 %631 }
 0x1a5   : > { %v636_v57 = vmul.f32 %v626_v56, %v2565_v34  ;;  %v638_v61 = vmul.f32 %v632_v58, %v2565_v34 }
 0x1a7   : > { %v640_v60 = vadd.f32 1e-05, %v636_v57  ;;  %v642_v62 = vadd.f32 1e-05, %v638_v61 }
 0x1a9   : > { %2238 = vrsqrt.f32 %v640_v60  ;;  %vm650_vm5 = vweird.f32 %v640_v60  ;;  %vm670_vm12 = vweird.f32 %v642_v62 }
 0x1aa   : > { %2240 = vrsqrt.f32 %v642_v62 }
 0x1ac   : > { %v635_v63 = vpop.xlane.xlu1 %634  ;;  %v629_v0 = vpop.xlane.xlu2 %628 }
 0x1ad   : > { %v639_v1 = vmul.f32 %v635_v63, %v2565_v34  ;;  %v637_v2 = vmul.f32 %v629_v0, %v2565_v34 }
 0x1af   : > { %v2239_v3 = vpop.eup %2238  ;;  %v643_v4 = vadd.f32 1e-05, %v639_v1  ;;  %v641_v5 = vadd.f32 1e-05, %v637_v2 }
 0x1b0   : > { %v645_v6 = vmul.f32 %v2239_v3, %v640_v60  ;;  %v2241_v9 = vpop.eup %2240  ;;  %vm651_vm4 = vweird.f32 %v2239_v3 }
 0x1b1   : > { %2242 = vrsqrt.f32 %v643_v4  ;;  %v665_v15 = vmul.f32 %v2241_v9, %v642_v62  ;;  %vm652_vm6 = vmor %vm650_vm5, %vm651_vm4  ;;  %vm660_vm8 = vweird.f32 %v641_v5  ;;  %vm680_vm10 = vweird.f32 %v643_v4 }
 0x1b2   : > { %v646_v7 = vmul.f32 %v2239_v3, %v645_v6  ;;  %2244 = vrsqrt.f32 %v641_v5  ;;  %vm671_vm13 = vweird.f32 %v2241_v9  ;;  %vm1077_vm4 = vcmask 126016  }
 0x1b3   : > { %v666_v20 = vmul.f32 %v2241_v9, %v665_v15  ;;  %vm672_vm15 = vmor %vm670_vm12, %vm671_vm13  ;;  %vm1248_vm5 = vcmask 191616  }
 0x1b4   : > { %v647_v8 = vmul.f32 0.5, %v646_v7 }
 0x1b5   : > { %v667_v27 = vmul.f32 0.5, %v666_v20 }
 0x1b6   : > { %v648_v10 = vsub.f32 1.5, %v647_v8 }
 0x1b7   : > { %v2243_v11 = vpop.eup %2242  ;;  %v668_v35 = vsub.f32 1.5, %v667_v27 }
 0x1b8   : > { %v2245_v12 = vpop.eup %2244  ;;  %v675_v13 = vmul.f32 %v2243_v11, %v643_v4  ;;  %v649_v14 = vmul.f32 %v2239_v3, %v648_v10  ;;  %vm681_vm11 = vweird.f32 %v2243_v11 }
 0x1b9   : > { %v655_v16 = vmul.f32 %v2245_v12, %v641_v5  ;;  %vm661_vm7 = vweird.f32 %v2245_v12  ;;  %vm682_vm14 = vmor %vm680_vm10, %vm681_vm11  ;;  %v669_v41 = vmul.f32 %v2241_v9, %v668_v35 }
 0x1ba   : > { %v676_v17 = vmul.f32 %v2243_v11, %v675_v13  ;;  %v653_v19 = vsel %vm652_vm6, %v2239_v3, %v649_v14  ;;  %vm662_vm9 = vmor %vm660_vm8, %vm661_vm7  ;;  %vm1419_vm6 = vcmask 257216  }
 0x1bb   : > { %v656_v18 = vmul.f32 %v2245_v12, %v655_v16  ;;  %v684_v25 = vmul.f32 %v653_v19, %v2571_v40  ;;  %v673_v44 = vsel %vm672_vm15, %v2241_v9, %v669_v41 }
 0x1bc   : > { %v677_v23 = vmul.f32 0.5, %v676_v17  ;;  %v686_v46 = vmul.f32 %v673_v44, %v2569_v39 }
 0x1bd   : > { %v657_v21 = vmul.f32 0.5, %v656_v18  ;;  %v689_v32 = vmul.f32 %v688_v26, %v684_v25 }
 0x1be   : > { %v678_v29 = vsub.f32 1.5, %v677_v23  ;;  %v691_v48 = vmul.f32 %v688_v26, %v686_v46 }
 0x1bf   : > { %v658_v24 = vsub.f32 1.5, %v657_v21  ;;  %v694_v38 = vadd.f32 %v693_v33, %v689_v32 }
 0x1c0   : > { %v679_v37 = vmul.f32 %v2243_v11, %v678_v29  ;;  %v696_v51 = vadd.f32 %v693_v33, %v691_v48 }
 0x1c1   : > { %v659_v28 = vmul.f32 %v2245_v12, %v658_v24 }
 0x1c2   : > { %v683_v43 = vsel %vm682_vm14, %v2243_v11, %v679_v37 }
 0x1c3   : > { %v663_v30 = vsel %vm662_vm9, %v2245_v12, %v659_v28  ;;  %v687_v45 = vmul.f32 %v683_v43, %v2581_v49 }
 0x1c4   : > { %v685_v31 = vmul.f32 %v663_v30, %v617_v50 }
 0x1c5   : > { %v692_v47 = vmul.f32 %v688_v26, %v687_v45 }
 0x1c6   : > { %v690_v36 = vmul.f32 %v688_v26, %v685_v31 }
 0x1c7   : > { %v697_v50 = vadd.f32 %v693_v33, %v692_v47 }
 0x1c8   : > { %v695_v40 = vadd.f32 %v693_v33, %v690_v36 }
 0x1c9   : > { %v699_v52 = vpack.c.bf16 %v697_v50, %v696_v51 }
 0x1ca   : > { %v698_v42 = vpack.c.bf16 %v695_v40, %v694_v38 }
 0x1cc   : > { %2084 = vmatmul.msk.bf16.vlgmr.msra.gmra.mxu0 %vm592_vm2, %v698_v42 }
 0x1dc   : > { %2085 = vmatmul.msk.bf16.gmra.mxu0 %vm592_vm2, %v699_v52 }
 0x249   : > { %v734_v54 = vpop.f32.mrf.mxu0 }
 0x24a   : > { %v735_v56 = vadd.f32 %v734_v54, %v2604_v55 }
 0x24c   : > { %v744_v58 = vpack.c.bf16 %v735_v56, %v735_v56 }
 0x24e   : > { %v750_v60 = vunpack.c.l.b16 %v744_v58 }
 0x251   : > { %v736_v57 = vpop.f32.mrf.mxu0 }
 0x252   : > { %v737_v59 = vadd.f32 %v736_v57, %v2604_v55 }
 0x254   : > { %v745_v49 = vpack.c.bf16 %v737_v59, %v737_v59 }
 0x256   : > { %v751_v39 = vunpack.c.l.b16 %v745_v49 }
 0x258   : > { %v2608_v61 = vpack.c.b16 %v751_v39, %v750_v60 }
 0x259   : > { %v739_v62 = vpop.f32.mrf.mxu0 }
 0x25a   : > { %913 = vrot.lane.b32.xlu1 %v2608_v61, %s2400_s30  ;;  %753 = vrot.lane.b32.xlu0 %v2608_v61, %s2401_s25  ;;  %v740_v63 = vadd.f32 %v739_v62, %v2604_v55 }
 0x25c   : > { %v746_v1 = vpack.c.bf16 %v740_v63, %v740_v63 }
 0x25e   : > { %v778_v4 = vunpack.c.l.b16 %v746_v1 }
 0x261   : > { %v741_v0 = vpop.f32.mrf.mxu0 }
 0x262   : > { %v742_v2 = vadd.f32 %v741_v0, %v2604_v55 }
 0x264   : > { %v747_v3 = vpack.c.bf16 %v742_v2, %v742_v2 }
 0x266   : > { %v779_v5 = vunpack.c.l.b16 %v747_v3 }
 0x268   : > { %v2614_v6 = vpack.c.b16 %v779_v5, %v778_v4 }
 0x26a   : > { %781 = vrot.lane.b32.xlu2 %v2614_v6, %s2401_s25  ;;  %935 = vrot.lane.b32.xlu1 %v2614_v6, %s2402_s26 }
 0x26b   : > { %937 = vrot.lane.b32.xlu0 %v2614_v6, %s2400_s30  ;;  %s2413_s30 = smov 24  }
 0x272   : > { %911 = vrot.lane.b32.xlu2 %v2608_v61, %s2402_s26  ;;  %1255 = vrot.lane.b32.xlu1 %v2608_v61, %s2403_s28 }
 0x273   : > { %1082 = vrot.lane.b32.xlu0 %v2608_v61, %s2404_s29 }
 0x27a   : > { %1084 = vrot.lane.b32.xlu2 %v2608_v61, %s2405_s13  ;;  %1279 = vrot.lane.b32.xlu1 %v2614_v6, %s2403_s28 }
 0x27b   : > { %1106 = vrot.lane.b32.xlu0 %v2614_v6, %s2404_s29 }
 0x282   : > { %1108 = vrot.lane.b32.xlu2 %v2614_v6, %s2405_s13  ;;  %1012 = vrot.lane.b32.xlu1 %v2608_v61, %s2406_s14 }
 0x283   : > { %1277 = vrot.lane.b32.xlu0 %v2614_v6, %s2407_s20 }
 0x28a   : > { %1253 = vrot.lane.b32.xlu2 %v2608_v61, %s2407_s20  ;;  %857 = vrot.lane.b32.xlu1 %v2608_v61, %s2408_s12 }
 0x292   : > { %882 = vrot.lane.b32.xlu1 %v2614_v6, %s2408_s12 }
 0x2c4   : > { %v782_v7 = vpop.permute.xlu2 %781 }
 0x2c5   : > { %v787_v8 = vsel %vm755_vm0, %v782_v7, 0 }
 0x2c6   : > { %796 = vmatpush.bf16.xpose.msra.mxu2 %v787_v8 }
 0x2cc   : > { %v912_v9 = vpop.permute.xlu2 %911  ;;  %v914_v10 = vpop.permute.xlu1 %913 }
 0x2cd   : > { %v754_v11 = vpop.permute.xlu0 %753  ;;  %2087 = vmatmul.msk.bf16.vlgmr.msra.gmra.mxu2 %vm755_vm0, %v2614_v6  ;;  %v919_v12 = vsel %vm755_vm0, %v914_v10, 0 }
 0x2ce   : > { %v760_v13 = vsel %vm755_vm0, %v754_v11, 0 }
 0x2cf   : > { %769 = vmatpush.bf16.xpose.msra.mxu1 %v760_v13 }
 0x2d4   : > { %v1085_v14 = vpop.permute.xlu2 %1084 }
 0x2d5   : > { %v1090_v15 = vsel %vm755_vm0, %v1085_v14, 0 }
 0x2d6   : > { %2086 = vmatmul.msk.bf16.vlgmr.msra.gmra.mxu1 %vm755_vm0, %v2608_v61 }
 0x2d7   : > { %928 = vmatpush.bf16.xpose.msrb.mxu1 %v919_v12 }
 0x2dc   : > { %v1109_v16 = vpop.permute.xlu2 %1108  ;;  %v936_v17 = vpop.permute.xlu1 %935 }
 0x2dd   : > { %v1114_v18 = vsel %vm755_vm0, %v1109_v16, 0  ;;  %v938_v19 = vpop.permute.xlu0 %937 }
 0x2de   : > { %v943_v20 = vsel %vm755_vm0, %v938_v19, 0 }
 0x2df   : > { %1099 = vmatpush.bf16.xpose.msra.mxu1 %v1090_v15  ;;  %952 = vmatpush.bf16.xpose.msrb.mxu2 %v943_v20 }
 0x2e4   : > { %v1256_v21 = vpop.permute.xlu1 %1255  ;;  %v1254_v31 = vpop.permute.xlu2 %1253 }
 0x2e5   : > { %v1261_v23 = vsel %vm755_vm0, %v1256_v21, 0  ;;  %v1083_v24 = vpop.permute.xlu0 %1082 }
 0x2e6   : > { %2090 = vmatmul.msk.bf16.vlgmr.msrb.gmra.mxu1 %vm755_vm0, %v912_v9  ;;  %2091 = vmatmul.msk.bf16.vlgmr.msrb.gmra.mxu2 %vm755_vm0, %v936_v17 }
 0x2e7   : > { %1123 = vmatpush.bf16.xpose.msra.mxu2 %v1114_v18  ;;  %1270 = vmatpush.bf16.xpose.msrb.mxu1 %v1261_v23 }
 0x2ec   : > { %v1280_v25 = vpop.permute.xlu1 %1279 }
 0x2ed   : > { %v1285_v26 = vsel %vm755_vm0, %v1280_v25, 0  ;;  %v1107_v28 = vpop.permute.xlu0 %1106 }
 0x2ef   : > { %1294 = vmatpush.bf16.xpose.msrb.mxu2 %v1285_v26 }
 0x2f4   : > { %v1013_v27 = vpop.permute.xlu1 %1012 }
 0x2f5   : > { %v1278_v32 = vpop.permute.xlu0 %1277 }
 0x2f6   : > { %2094 = vmatmul.msk.bf16.vlgmr.msra.gmra.mxu1 %vm755_vm0, %v1083_v24  ;;  %2095 = vmatmul.msk.bf16.vlgmr.msra.gmra.mxu2 %vm755_vm0, %v1107_v28 }
 0x2fc   : > { %v858_v29 = vpop.permute.xlu1 %857 }
 0x2fd   : > { %870 = vmatpush.bf16.msrb.mxu0 %v858_v29 }
 0x304   : > { %v883_v30 = vpop.permute.xlu1 %882 }
 0x305   : > { %895 = vmatpush.bf16.msra.mxu3 %v883_v30 }
 0x306   : > { %2098 = vmatmul.msk.bf16.vlgmr.msrb.gmra.mxu1 %vm755_vm0, %v1254_v31  ;;  %2099 = vmatmul.msk.bf16.vlgmr.msrb.gmra.mxu2 %vm755_vm0, %v1278_v32 }
 0x309   : > { %1025 = vmatpush.bf16.msrb.mxu3 %v1013_v27 }
 0x350   : > { %v2650_v33 = vpop.f32.mrf.mxu2 }
 0x351   : > { %v810_v35 = vsel %vm803_vm1, %v2650_v33, -inf }
 0x352   : > { %811 = vmax.xlane.f32.xlu2 %v810_v35 }
 0x353   : > { %v771_v36 = vpop.f32.mrf.mxu1 }
 0x354   : > { %v804_v37 = vsel %vm803_vm1, %v771_v36, -inf }
 0x355   : > { %805 = vmax.xlane.f32.xlu1 %v804_v37 }
 0x358   : > { %v800_v38 = vpop.f32.mrf.mxu2 }
 0x359   : > { %v813_v41 = vsel %vm803_vm1, %v800_v38, -inf }
 0x35b   : > { %v773_v40 = vpop.f32.mrf.mxu1 }
 0x35c   : > { %v807_v42 = vsel %vm803_vm1, %v773_v40, -inf }
 0x35d   : > { %814 = vmax.xlane.f32.xlu1 %v813_v41  ;;  %808 = vmax.xlane.f32.xlu0 %v807_v42 }
 0x363   : > { %v930_v43 = vpop.f32.mrf.mxu1 }
 0x364   : > { %v959_v44 = vsel %vm803_vm1, %v930_v43, -inf }
 0x365   : > { %960 = vmax.xlane.f32.xlu0 %v959_v44 }
 0x369   : > { %v2658_v45 = vpop.f32.mrf.mxu2 }
 0x36a   : > { %v965_v48 = vsel %vm803_vm1, %v2658_v45, -inf }
 0x36b   : > { %v2660_v46 = vpop.f32.mrf.mxu1 }
 0x36c   : > { %v962_v47 = vsel %vm803_vm1, %v2660_v46, -inf }
 0x36d   : > { %963 = vmax.xlane.f32.xlu2 %v962_v47  ;;  %966 = vmax.xlane.f32.xlu0 %v965_v48 }
 0x371   : > { %v2666_v50 = vpop.f32.mrf.mxu2 }
 0x372   : > { %v968_v57 = vsel %vm803_vm1, %v2666_v50, -inf }
 0x373   : > { %v2668_v51 = vpop.f32.mrf.mxu1 }
 0x374   : > { %v1130_v52 = vsel %vm803_vm1, %v2668_v51, -inf }
 0x375   : > { %1131 = vmax.xlane.f32.xlu2 %v1130_v52 }
 0x376   : > { %1183 = vrot.lane.b32.xlu1 %v2608_v61, %s2409_s18 }
 0x379   : > { %v2674_v53 = vpop.f32.mrf.mxu2 }
 0x37a   : > { %v1136_v54 = vsel %vm803_vm1, %v2674_v53, -inf }
 0x37b   : > { %v2678_v56 = vpop.f32.mrf.mxu1  ;;  %1137 = vmax.xlane.f32.xlu0 %v1136_v54 }
 0x37c   : > { %v1133_v2 = vsel %vm803_vm1, %v2678_v56, -inf }
 0x37d   : > { %969 = vmax.xlane.f32.xlu2 %v968_v57 }
 0x381   : > { %v2682_v58 = vpop.f32.mrf.mxu2 }
 0x382   : > { %v1139_v49 = vsel %vm803_vm1, %v2682_v58, -inf }
 0x383   : > { %v2684_v59 = vpop.f32.mrf.mxu1 }
 0x384   : > { %v1301_v3 = vsel %vm803_vm1, %v2684_v59, -inf }
 0x385   : > { %1140 = vmax.xlane.f32.xlu2 %v1139_v49 }
 0x389   : > { %v2688_v60 = vpop.f32.mrf.mxu2 }
 0x38a   : > { %v1307_v1 = vsel %vm803_vm1, %v2688_v60, -inf }
 0x38b   : > { %v2690_v39 = vpop.f32.mrf.mxu1 }
 0x38c   : > { %v1304_v62 = vsel %vm803_vm1, %v2690_v39, -inf }
 0x38d   : > { %1305 = vmax.xlane.f32.xlu0 %v1304_v62 }
 0x391   : > { %v2694_v63 = vpop.f32.mrf.mxu2 }
 0x392   : > { %v1310_v0 = vsel %vm803_vm1, %v2694_v63, -inf }
 0x393   : > { %1311 = vmax.xlane.f32.xlu2 %v1310_v0 }
 0x395   : > { %1308 = vmax.xlane.f32.xlu0 %v1307_v1 }
 0x3a0   : > { %1134 = vmax.xlane.f32.xlu1 %v1133_v2 }
 0x3a8   : > { %1302 = vmax.xlane.f32.xlu1 %v1301_v3 }
 0x3c5   : > { %v812_v10 = vpop.xlane.xlu2 %811 }
 0x3c6   : > { %v818_v16 = vsub.f32 %v2650_v33, %v812_v10 }
 0x3c8   : > { %v806_v4 = vpop.xlane.xlu1 %805  ;;  %v824_v18 = vmul.f32 1.442695, %v818_v16 }
 0x3c9   : > { %v816_v5 = vsub.f32 %v771_v36, %v806_v4 }
 0x3cb   : > { %v820_v7 = vmul.f32 1.442695, %v816_v5 }
 0x3cd   : > { %2246 = vpow2.f32 %v820_v7 }
 0x3d0   : > { %v815_v8 = vpop.xlane.xlu1 %814  ;;  %v809_v9 = vpop.xlane.xlu0 %808 }
 0x3d1   : > { %v819_v11 = vsub.f32 %v800_v38, %v815_v8  ;;  %v817_v12 = vsub.f32 %v773_v40, %v809_v9 }
 0x3d3   : > { %v2704_v13 = vpop.eup %2246  ;;  %v826_v14 = vmul.f32 1.442695, %v819_v11  ;;  %v822_v15 = vmul.f32 1.442695, %v817_v12 }
 0x3d4   : > { %v828_v17 = vsel %vm803_vm1, %v2704_v13, 0.0 }
 0x3d5   : > { %2248 = vpow2.f32 %v826_v14  ;;  %829 = vadd.xlane.f32.xlu0 %v828_v17 }
 0x3d6   : > { %2250 = vpow2.f32 %v822_v15 }
 0x3d7   : > { %2252 = vpow2.f32 %v824_v18 }
 0x3d8   : > { %v961_v19 = vpop.xlane.xlu0 %960 }
 0x3d9   : > { %v971_v20 = vsub.f32 %v930_v43, %v961_v19 }
 0x3db   : > { %v2709_v21 = vpop.eup %2248  ;;  %v975_v23 = vmul.f32 1.442695, %v971_v20 }
 0x3dc   : > { %v2711_v24 = vpop.eup %2250  ;;  %v837_v25 = vsel %vm803_vm1, %v2709_v21, 0.0 }
 0x3dd   : > { %2254 = vpow2.f32 %v975_v23  ;;  %838 = vadd.xlane.f32.xlu1 %v837_v25  ;;  %v831_v26 = vsel %vm803_vm1, %v2711_v24, 0.0  ;;  %v2718_v29 = vpop.eup %2252 }
 0x3de   : > { %832 = vadd.xlane.f32.xlu2 %v831_v26  ;;  %v834_v33 = vsel %vm803_vm1, %v2718_v29, 0.0 }
 0x3e0   : > { %v964_v27 = vpop.xlane.xlu2 %963  ;;  %v967_v35 = vpop.xlane.xlu0 %966 }
 0x3e1   : > { %v972_v28 = vsub.f32 %v2660_v46, %v964_v27  ;;  %v973_v40 = vsub.f32 %v2658_v45, %v967_v35 }
 0x3e3   : > { %v2720_v30 = vpop.eup %2254  ;;  %v977_v31 = vmul.f32 1.442695, %v972_v28  ;;  %v979_v43 = vmul.f32 1.442695, %v973_v40 }
 0x3e4   : > { %v983_v32 = vsel %vm803_vm1, %v2720_v30, 0.0 }
 0x3e5   : > { %2256 = vpow2.f32 %v977_v31  ;;  %984 = vadd.xlane.f32.xlu0 %v983_v32 }
 0x3e6   : > { %835 = vadd.xlane.f32.xlu2 %v834_v33 }
 0x3e8   : > { %v1132_v36 = vpop.xlane.xlu2 %1131 }
 0x3e9   : > { %v1142_v37 = vsub.f32 %v2668_v51, %v1132_v36  ;;  %v2744_v51 = vpop.permute.xlu1 %1183 }
 0x3eb   : > { %v2727_v38 = vpop.eup %2256  ;;  %v1146_v41 = vmul.f32 1.442695, %v1142_v37 }
 0x3ec   : > { %v986_v42 = vsel %vm803_vm1, %v2727_v38, 0.0 }
 0x3ed   : > { %2258 = vpow2.f32 %v1146_v41 }
 0x3ee   : > { %987 = vadd.xlane.f32.xlu2 %v986_v42  ;;  %2260 = vpow2.f32 %v979_v43  ;;  %v1138_v54 = vpop.xlane.xlu0 %1137 }
 0x3f0   : > { %v970_v48 = vpop.xlane.xlu2 %969 }
 0x3f1   : > { %v974_v0 = vsub.f32 %v2666_v50, %v970_v48 }
 0x3f3   : > { %v2732_v44 = vpop.eup %2258  ;;  %v981_v3 = vmul.f32 1.442695, %v974_v0 }
 0x3f4   : > { %v1154_v46 = vsel %vm803_vm1, %v2732_v44, 0.0  ;;  %v2738_v47 = vpop.eup %2260 }
 0x3f5   : > { %1155 = vadd.xlane.f32.xlu0 %v1154_v46  ;;  %v989_v45 = vsel %vm803_vm1, %v2738_v47, 0.0 }
 0x3f6   : > { %1037 = vrot.lane.b32.xlu1 %v2614_v6, %s2406_s14 }
 0x3f8   : > { %v1141_v52 = vpop.xlane.xlu2 %1140 }
 0x3f9   : > { %v1145_v15 = vsub.f32 %v2682_v58, %v1141_v52 }
 0x3fb   : > { %v1152_v17 = vmul.f32 1.442695, %v1145_v15 }
 0x3fd   : > { %990 = vadd.xlane.f32.xlu0 %v989_v45 }
 0x3fe   : > { %1354 = vrot.lane.b32.xlu1 %v2608_v61, %s2410_s22 }
 0x400   : > { %v1306_v5 = vpop.xlane.xlu0 %1305 }
 0x401   : > { %v1314_v9 = vsub.f32 %v2690_v39, %v1306_v5 }
 0x406   : > { %v1312_v57 = vpop.xlane.xlu2 %1311 }
 0x407   : > { %v1316_v1 = vsub.f32 %v2694_v63, %v1312_v57  ;;  %v1319_v63 = vmul.f32 1.442695, %v1314_v9 }
 0x408   : > { %v1309_v18 = vpop.xlane.xlu0 %1308 }
 0x409   : > { %v1323_v4 = vmul.f32 1.442695, %v1316_v1  ;;  %v1315_v58 = vsub.f32 %v2688_v60, %v1309_v18 }
 0x40b   : > { %v1321_v26 = vmul.f32 1.442695, %v1315_v58 }
 0x413   : > { %v1135_v49 = vpop.xlane.xlu1 %1134 }
 0x414   : > { %v1143_v62 = vsub.f32 %v2678_v56, %v1135_v49  ;;  %v1144_v56 = vsub.f32 %v2674_v53, %v1138_v54 }
 0x416   : > { %v1148_v2 = vmul.f32 1.442695, %v1143_v62  ;;  %v1150_v12 = vmul.f32 1.442695, %v1144_v56 }
 0x418   : > { %2262 = vpow2.f32 %v1148_v2 }
 0x419   : > { %2264 = vpow2.f32 %v981_v3 }
 0x41a   : > { %2266 = vpow2.f32 %v1323_v4 }
 0x41b   : > { %v1303_v7 = vpop.xlane.xlu1 %1302 }
 0x41c   : > { %v1313_v61 = vsub.f32 %v2684_v59, %v1303_v7 }
 0x41e   : > { %v2750_v8 = vpop.eup %2262  ;;  %v1317_v10 = vmul.f32 1.442695, %v1313_v61 }
 0x41f   : > { %v1157_v50 = vsel %vm803_vm1, %v2750_v8, 0.0  ;;  %v2756_v11 = vpop.eup %2264 }
 0x420   : > { %2268 = vpow2.f32 %v1317_v10  ;;  %1158 = vadd.xlane.f32.xlu2 %v1157_v50  ;;  %v2758_v14 = vpop.eup %2266  ;;  %v992_v39 = vsel %vm803_vm1, %v2756_v11, 0.0 }
 0x421   : > { %2270 = vpow2.f32 %v1319_v63  ;;  %v1334_v53 = vsel %vm803_vm1, %v2758_v14, 0.0 }
 0x422   : > { %2272 = vpow2.f32 %v1150_v12 }
 0x423   : > { %2274 = vpow2.f32 %v1152_v17 }
 0x424   : > { %2276 = vpow2.f32 %v1321_v26 }
 0x426   : > { %v2760_v59 = vpop.eup %2268 }
 0x427   : > { %v1325_v16 = vsel %vm803_vm1, %v2760_v59, 0.0  ;;  %v2769_v19 = vpop.eup %2270 }
 0x428   : > { %1335 = vadd.xlane.f32.xlu1 %v1334_v53  ;;  %993 = vadd.xlane.f32.xlu2 %v992_v39  ;;  %v2771_v20 = vpop.eup %2272  ;;  %v1328_v23 = vsel %vm803_vm1, %v2769_v19, 0.0 }
 0x429   : > { %1326 = vadd.xlane.f32.xlu0 %v1325_v16  ;;  %v1160_v25 = vsel %vm803_vm1, %v2771_v20, 0.0  ;;  %v2778_v27 = vpop.eup %2274 }
 0x42a   : > { %v1163_v28 = vsel %vm803_vm1, %v2778_v27, 0.0  ;;  %v2782_v31 = vpop.eup %2276 }
 0x42b   : > { %v1331_v60 = vsel %vm803_vm1, %v2782_v31, 0.0 }
 0x430   : > { %1329 = vadd.xlane.f32.xlu2 %v1328_v23 }
 0x431   : > { %1161 = vadd.xlane.f32.xlu0 %v1160_v25 }
 0x438   : > { %1164 = vadd.xlane.f32.xlu2 %v1163_v28 }
 0x440   : > { %1332 = vadd.xlane.f32.xlu2 %v1331_v60 }
 0x445   : > { %1208 = vrot.lane.b32.xlu0 %v2614_v6, %s2409_s18 }
 0x448   : > { %v830_v32 = vpop.xlane.xlu0 %829 }
 0x449   : > { %2278 = vrcp.f32 %v830_v32 }
 0x44f   : > { %v2279_v36 = vpop.eup %2278 }
 0x450   : > { %v839_v33 = vpop.xlane.xlu1 %838  ;;  %v844_v37 = vmul.f32 %v2279_v36, %v2704_v13 }
 0x451   : > { %v833_v35 = vpop.xlane.xlu2 %832 }
 0x452   : > { %2280 = vrcp.f32 %v833_v35  ;;  %v848_v41 = vpack.c.bf16 %v844_v37, %v844_v37 }
 0x453   : > { %2282 = vrcp.f32 %v839_v33 }
 0x454   : > { %v854_v48 = vunpack.c.l.b16 %v848_v41 }
 0x458   : > { %v2281_v40 = vpop.eup %2280  ;;  %1379 = vrot.lane.b32.xlu2 %v2614_v6, %s2410_s22  ;;  %v985_v62 = vpop.xlane.xlu0 %984 }
 0x459   : > { %v845_v42 = vmul.f32 %v2281_v40, %v2711_v24  ;;  %v836_v43 = vpop.xlane.xlu2 %835  ;;  %v2283_v46 = vpop.eup %2282 }
 0x45a   : > { %2284 = vrcp.f32 %v836_v43  ;;  %v847_v54 = vmul.f32 %v2283_v46, %v2709_v21 }
 0x45b   : > { %v849_v45 = vpack.c.bf16 %v845_v42, %v845_v42 }
 0x45c   : > { %v851_v6 = vpack.c.bf16 %v847_v54, %v847_v54 }
 0x45d   : > { %v855_v52 = vunpack.c.l.b16 %v849_v45 }
 0x45e   : > { %v880_v2 = vunpack.c.l.b16 %v851_v6 }
 0x45f   : > { %v856_v57 = vpack.c.b16 %v855_v52, %v854_v48 }
 0x460   : > { %v2285_v49 = vpop.eup %2284 }
 0x461   : > { %v988_v0 = vpop.xlane.xlu2 %987  ;;  %2088 = vmatmul.msk.bf16.vlgmr.msrb.gmra.mxu0 %vm803_vm1, %v856_v57  ;;  %v846_v13 = vmul.f32 %v2285_v49, %v2718_v29 }
 0x462   : > { %2286 = vrcp.f32 %v988_v0 }
 0x463   : > { %v850_v1 = vpack.c.bf16 %v846_v13, %v846_v13  ;;  %2288 = vrcp.f32 %v985_v62 }
 0x465   : > { %v879_v24 = vunpack.c.l.b16 %v850_v1 }
 0x467   : > { %v881_v3 = vpack.c.b16 %v880_v2, %v879_v24 }
 0x468   : > { %v2287_v4 = vpop.eup %2286  ;;  %v1038_v5 = vpop.permute.xlu1 %1037 }
 0x469   : > { %2089 = vmatmul.msk.bf16.vlgmr.msra.gmra.mxu3 %vm803_vm1, %v881_v3  ;;  %1050 = vmatpush.bf16.msra.mxu0 %v1038_v5  ;;  %v2289_v21 = vpop.eup %2288  ;;  %v1000_v7 = vmul.f32 %v2287_v4, %v2727_v38  ;;  %v1156_v12 = vpop.xlane.xlu0 %1155 }
 0x46a   : > { %1196 = vmatpush.bf16.msra.mxu3 %v2744_v51  ;;  %v999_v61 = vmul.f32 %v2289_v21, %v2720_v30  ;;  %2290 = vrcp.f32 %v1156_v12 }
 0x46b   : > { %v1004_v29 = vpack.c.bf16 %v1000_v7, %v1000_v7 }
 0x46c   : > { %v1003_v9 = vpack.c.bf16 %v999_v61, %v999_v61 }
 0x46d   : > { %v1010_v10 = vunpack.c.l.b16 %v1004_v29 }
 0x46e   : > { %v1009_v56 = vunpack.c.l.b16 %v1003_v9 }
 0x470   : > { %v1011_v50 = vpack.c.b16 %v1010_v10, %v1009_v56  ;;  %v1355_v63 = vpop.permute.xlu1 %1354  ;;  %v2291_v53 = vpop.eup %2290 }
 0x471   : > { %v991_v39 = vpop.xlane.xlu0 %990  ;;  %v1170_v51 = vmul.f32 %v2291_v53, %v2732_v44 }
 0x473   : > { %v1174_v30 = vpack.c.bf16 %v1170_v51, %v1170_v51 }
 0x475   : > { %v1180_v25 = vunpack.c.l.b16 %v1174_v30 }
 0x479   : > { %2092 = vmatmul.msk.bf16.vlgmr.msrb.gmra.mxu3 %vm803_vm1, %v1011_v50 }
 0x47a   : > { %1367 = vmatpush.bf16.msrb.mxu3 %v1355_v63 }
 0x493   : > { %v1159_v15 = vpop.xlane.xlu2 %1158 }
 0x494   : > { %2292 = vrcp.f32 %v1159_v15 }
 0x495   : > { %2294 = vrcp.f32 %v991_v39 }
 0x49a   : > { %v2293_v38 = vpop.eup %2292 }
 0x49b   : > { %v1171_v16 = vmul.f32 %v2293_v38, %v2750_v8  ;;  %v994_v17 = vpop.xlane.xlu2 %993  ;;  %v2295_v58 = vpop.eup %2294 }
 0x49c   : > { %v1327_v18 = vpop.xlane.xlu0 %1326  ;;  %2296 = vrcp.f32 %v994_v17  ;;  %v1001_v28 = vmul.f32 %v2295_v58, %v2738_v47  ;;  %v1336_v1 = vpop.xlane.xlu1 %1335 }
 0x49d   : > { %v1175_v23 = vpack.c.bf16 %v1171_v16, %v1171_v16  ;;  %2298 = vrcp.f32 %v1327_v18 }
 0x49e   : > { %v1005_v35 = vpack.c.bf16 %v1001_v28, %v1001_v28 }
 0x49f   : > { %v1181_v26 = vunpack.c.l.b16 %v1175_v23 }
 0x4a0   : > { %v1034_v41 = vunpack.c.l.b16 %v1005_v35 }
 0x4a1   : > { %v1182_v60 = vpack.c.b16 %v1181_v26, %v1180_v25 }
 0x4a2   : > { %v2297_v32 = vpop.eup %2296 }
 0x4a3   : > { %v1330_v33 = vpop.xlane.xlu2 %1329  ;;  %2096 = vmatmul.msk.bf16.vlgmr.msra.gmra.mxu3 %vm803_vm1, %v1182_v60  ;;  %v2299_v44 = vpop.eup %2298  ;;  %v1002_v36 = vmul.f32 %v2297_v32, %v2756_v11 }
 0x4a4   : > { %2300 = vrcp.f32 %v1330_v33  ;;  %v1162_v8 = vpop.xlane.xlu0 %1161  ;;  %v1341_v40 = vmul.f32 %v2299_v44, %v2760_v59 }
 0x4a5   : > { %v1006_v37 = vpack.c.bf16 %v1002_v36, %v1002_v36  ;;  %2302 = vrcp.f32 %v1162_v8 }
 0x4a6   : > { %v1345_v47 = vpack.c.bf16 %v1341_v40, %v1341_v40 }
 0x4a7   : > { %v1035_v42 = vunpack.c.l.b16 %v1006_v37 }
 0x4a8   : > { %v1351_v11 = vunpack.c.l.b16 %v1345_v47 }
 0x4a9   : > { %v1036_v46 = vpack.c.b16 %v1035_v42, %v1034_v41 }
 0x4aa   : > { %v2301_v43 = vpop.eup %2300 }
 0x4ab   : > { %v1342_v45 = vmul.f32 %v2301_v43, %v2769_v19  ;;  %v1165_v48 = vpop.xlane.xlu2 %1164  ;;  %v2303_v52 = vpop.eup %2302  ;;  %2093 = vmatmul.msk.bf16.vlgmr.msra.gmra.mxu0 %vm803_vm1, %v1036_v46 }
 0x4ac   : > { %2304 = vrcp.f32 %v1165_v48  ;;  %v1172_v49 = vmul.f32 %v2303_v52, %v2771_v20  ;;  %v2175_v52 = vld [vmem:[%s2513_s15 + $0x8] sm:$0xff] }
 0x4ad   : > { %v1346_v54 = vpack.c.bf16 %v1342_v45, %v1342_v45  ;;  %1466 = vmatpush.bf16.msra.mxu1 %v2175_v52 }
 0x4ae   : > { %v1176_v59 = vpack.c.bf16 %v1172_v49, %v1172_v49 }
 0x4af   : > { %v1352_v57 = vunpack.c.l.b16 %v1346_v54 }
 0x4b0   : > { %v1205_v24 = vunpack.c.l.b16 %v1176_v59 }
 0x4b1   : > { %v1353_v62 = vpack.c.b16 %v1352_v57, %v1351_v11  ;;  %v2174_v11 = vld [vmem:[%s2513_s15] sm:$0xff]  ;;  %s2414_s15 = smov 32  }
 0x4b2   : > { %v2305_v0 = vpop.eup %2304  ;;  %1467 = vmatpush.bf16.msra.mxu1 %v2174_v11 }
 0x4b3   : > { %v1173_v13 = vmul.f32 %v2305_v0, %v2778_v27  ;;  %v1333_v6 = vpop.xlane.xlu2 %1332  ;;  %2100 = vmatmul.msk.bf16.vlgmr.msrb.gmra.mxu3 %vm803_vm1, %v1353_v62 }
 0x4b4   : > { %2306 = vrcp.f32 %v1333_v6 }
 0x4b5   : > { %v1177_v19 = vpack.c.bf16 %v1173_v13, %v1173_v13  ;;  %2308 = vrcp.f32 %v1336_v1 }
 0x4b7   : > { %v1206_v2 = vunpack.c.l.b16 %v1177_v19  ;;  %v1209_v3 = vpop.permute.xlu0 %1208 }
 0x4b8   : > { %1221 = vmatpush.bf16.msrb.mxu0 %v1209_v3 }
 0x4b9   : > { %v1207_v4 = vpack.c.b16 %v1206_v2, %v1205_v24  ;;  %v1483_v2 = vperm.slane %v2594_v22, 2  ;;  %v2336_v22 = vld [vmem:[#allocation2 + $0x10] sm:$0xff] }
 0x4ba   : > { %v2307_v5 = vpop.eup %2306 }
 0x4bb   : > { %v1380_v21 = vpop.permute.xlu2 %1379  ;;  %2097 = vmatmul.msk.bf16.vlgmr.msrb.gmra.mxu0 %vm803_vm1, %v1207_v4  ;;  %v2309_v20 = vpop.eup %2308  ;;  %v1343_v27 = vmul.f32 %v2307_v5, %v2782_v31  ;;  %v2334_v4 = vld [vmem:[#allocation2] sm:$0xff] }
 0x4bc   : > { %1392 = vmatpush.bf16.msra.mxu0 %v1380_v21  ;;  %v1344_v7 = vmul.f32 %v2309_v20, %v2758_v14 }
 0x4bd   : > { %v1347_v61 = vpack.c.bf16 %v1343_v27, %v1343_v27 }
 0x4be   : > { %v1348_v29 = vpack.c.bf16 %v1344_v7, %v1344_v7  ;;  %v2335_v7 = vld [vmem:[#allocation2 + $0x8] sm:$0xff] }
 0x4bf   : > { %v1376_v9 = vunpack.c.l.b16 %v1347_v61 }
 0x4c0   : > { %v1377_v10 = vunpack.c.l.b16 %v1348_v29 }
 0x4c2   : > { %v1378_v56 = vpack.c.b16 %v1377_v10, %v1376_v9 }
 0x4cb   : > { %2101 = vmatmul.msk.bf16.vlgmr.msra.gmra.mxu0 %vm803_vm1, %v1378_v56 }
 0x4de   : > { %v872_v50 = vpop.f32.mrf.mxu0 }
 0x4df   : > { %v902_v63 = vpack.c.bf16 %v872_v50, %v872_v50 }
 0x4e1   : > { %907 = vst.msk [vmem:[#allocation3] sm:$0xf] %vm906_vm3, %v902_v63 }
 0x4e6   : > { %v874_v12 = vpop.f32.mrf.mxu0 }
 0x4e7   : > { %v903_v15 = vpack.c.bf16 %v874_v12, %v874_v12 }
 0x4e9   : > { %908 = vst.msk [vmem:[#allocation3 + $0x4] sm:$0xf] %vm906_vm3, %v903_v15  ;;  %v2337_v15 = vld [vmem:[#allocation2 + $0x18] sm:$0xff] }
 0x4ec   : > { %v897_v53 = vpop.f32.mrf.mxu3 }
 0x4ed   : > { %v904_v39 = vpack.c.bf16 %v897_v53, %v897_v53 }
 0x4ef   : > { %909 = vst.msk [vmem:[#allocation3 + $0x8] sm:$0xf] %vm906_vm3, %v904_v39 }
 0x4f4   : > { %v899_v31 = vpop.f32.mrf.mxu3 }
 0x4f5   : > { %v905_v51 = vpack.c.bf16 %v899_v31, %v899_v31 }
 0x4f7   : > { %910 = vst.msk [vmem:[#allocation3 + $0xc] sm:$0xf] %vm906_vm3, %v905_v51 }
 0x4fc   : > { %v1027_v14 = vpop.f32.mrf.mxu3 }
 0x4fd   : > { %v1057_v38 = vpack.c.bf16 %v1027_v14, %v1027_v14 }
 0x4ff   : > { %1065 = vrot.lane.b32.xlu0 %v1057_v38, %s2411_s24 }
 0x504   : > { %v1029_v30 = vpop.f32.mrf.mxu3 }
 0x505   : > { %v1058_v16 = vpack.c.bf16 %v1029_v30, %v1029_v30 }
 0x507   : > { %1067 = vrot.lane.b32.xlu0 %v1058_v16, %s2411_s24 }
 0x526   : > { %v1198_v17 = vpop.f32.mrf.mxu3 }
 0x527   : > { %v1228_v33 = vpack.c.bf16 %v1198_v17, %v1198_v17 }
 0x528   : > { %v1052_v18 = vpop.f32.mrf.mxu0 }
 0x529   : > { %v1059_v58 = vpack.c.bf16 %v1052_v18, %v1052_v18 }
 0x52b   : > { %1069 = vrot.lane.b32.xlu1 %v1059_v58, %s2411_s24 }
 0x52e   : > { %v1200_v23 = vpop.f32.mrf.mxu3 }
 0x52f   : > { %v1229_v25 = vpack.c.bf16 %v1200_v23, %v1200_v23 }
 0x530   : > { %v1054_v26 = vpop.f32.mrf.mxu0 }
 0x531   : > { %1238 = vrot.lane.b32.xlu0 %v1229_v25, %s2412_s16  ;;  %v1060_v28 = vpack.c.bf16 %v1054_v26, %v1054_v26 }
 0x533   : > { %1071 = vrot.lane.b32.xlu2 %v1060_v28, %s2411_s24 }
 0x536   : > { %v1369_v60 = vpop.f32.mrf.mxu3 }
 0x537   : > { %v1399_v8 = vpack.c.bf16 %v1369_v60, %v1369_v60 }
 0x538   : > { %v1223_v32 = vpop.f32.mrf.mxu0 }
 0x539   : > { %v1230_v37 = vpack.c.bf16 %v1223_v32, %v1223_v32 }
 0x53b   : > { %1236 = vrot.lane.b32.xlu2 %v1228_v33, %s2412_s16 }
 0x53e   : > { %v1371_v44 = vpop.f32.mrf.mxu3 }
 0x53f   : > { %v1400_v35 = vpack.c.bf16 %v1371_v44, %v1371_v44 }
 0x540   : > { %v1225_v36 = vpop.f32.mrf.mxu0 }
 0x541   : > { %1409 = vrot.lane.b32.xlu0 %v1400_v35, %s2413_s30  ;;  %v1231_v41 = vpack.c.bf16 %v1225_v36, %v1225_v36 }
 0x543   : > { %1407 = vrot.lane.b32.xlu2 %v1399_v8, %s2413_s30 }
 0x548   : > { %v1394_v40 = vpop.f32.mrf.mxu0 }
 0x549   : > { %1240 = vrot.lane.b32.xlu0 %v1230_v37, %s2412_s16  ;;  %v1401_v42 = vpack.c.bf16 %v1394_v40, %v1394_v40 }
 0x54b   : > { %1242 = vrot.lane.b32.xlu2 %v1231_v41, %s2412_s16  ;;  %v2177_v41 = vld [vmem:[%s2523_s23 + $0x8] sm:$0xff] }
 0x54c   : > { %1623 = vmatpush.bf16.msra.mxu2 %v2177_v41 }
 0x550   : > { %v1396_v43 = vpop.f32.mrf.mxu0 }
 0x551   : > { %1411 = vrot.lane.b32.xlu0 %v1401_v42, %s2413_s30  ;;  %v1402_v46 = vpack.c.bf16 %v1396_v43, %v1396_v43 }
 0x553   : > { %1413 = vrot.lane.b32.xlu2 %v1402_v46, %s2413_s30  ;;  %v2176_v46 = vld [vmem:[%s2523_s23] sm:$0xff] }
 0x554   : > { %1624 = vmatpush.bf16.msra.mxu2 %v2176_v46 }
 0x571   : > { %v1066_v47 = vpop.permute.xlu0 %1065 }
 0x572   : > { %1078 = vst.msk [vmem:[#allocation3] sm:$0xf] %vm1077_vm4, %v1066_v47 }
 0x579   : > { %v1068_v45 = vpop.permute.xlu0 %1067 }
 0x57a   : > { %1079 = vst.msk [vmem:[#allocation3 + $0x4] sm:$0xf] %vm1077_vm4, %v1068_v45 }
 0x58d   : > { %v1072_v48 = vpop.permute.xlu2 %1071 }
 0x58e   : > { %1081 = vst.msk [vmem:[#allocation3 + $0xc] sm:$0xf] %vm1077_vm4, %v1072_v48 }
 0x595   : > { %v1237_v54 = vpop.permute.xlu2 %1236 }
 0x596   : > { %1249 = vst.msk [vmem:[#allocation3] sm:$0xf] %vm1248_vm5, %v1237_v54 }
 0x59d   : > { %v1070_v57 = vpop.permute.xlu1 %1069  ;;  %v1408_v49 = vpop.permute.xlu2 %1407 }
 0x59e   : > { %1080 = vst.msk [vmem:[#allocation3 + $0x8] sm:$0xf] %vm1077_vm4, %v1070_v57  ;;  %v2338_v57 = vld [vmem:[%s2518_s21] sm:$0x3] }
 0x59f   : > { %1420 = vst.msk [vmem:[#allocation3] sm:$0xf] %vm1419_vm6, %v1408_v49 }
 0x5a3   : > { %v1239_v62 = vpop.permute.xlu0 %1238 }
 0x5a4   : > { %1250 = vst.msk [vmem:[#allocation3 + $0x4] sm:$0xf] %vm1248_vm5, %v1239_v62 }
 0x5a5   : > { %v1243_v0 = vpop.permute.xlu2 %1242 }
 0x5a6   : > { %1252 = vst.msk [vmem:[#allocation3 + $0xc] sm:$0xf] %vm1248_vm5, %v1243_v0 }
 0x5ad   : > { %v1414_v59 = vpop.permute.xlu2 %1413 }
 0x5ae   : > { %1423 = vst.msk [vmem:[#allocation3 + $0xc] sm:$0xf] %vm1419_vm6, %v1414_v59 }
 0x5b3   : > { %v1410_v13 = vpop.permute.xlu0 %1409 }
 0x5b4   : > { %1421 = vst.msk [vmem:[#allocation3 + $0x4] sm:$0xf] %vm1419_vm6, %v1410_v13 }
 0x5bb   : > { %v1241_v6 = vpop.permute.xlu0 %1240  ;;  %v2172_v1 = vld [vmem:[#allocation3] sm:$0xff] }
 0x5bc   : > { %1251 = vst.msk [vmem:[#allocation3 + $0x8] sm:$0xf] %vm1248_vm5, %v1241_v6  ;;  %2118 = vmatmul.msk.bf16.vlgmr.msra.gmra.mxu1 %vm592_vm2, %v2172_v1 }
 0x5c3   : > { %v1412_v19 = vpop.permute.xlu0 %1411 }
 0x5c4   : > { %1422 = vst.msk [vmem:[#allocation3 + $0x8] sm:$0xf] %vm1419_vm6, %v1412_v19  ;;  %vm1786_vm6 = vcmask 523264  }
 0x5cb   : > { %v2173_v24 = vld [vmem:[#allocation3 + $0x8] sm:$0xff] }
 0x5cc   : > { %2119 = vmatmul.msk.bf16.gmra.mxu1 %vm592_vm2, %v2173_v24 }
 0x639   : > { %v1469_v3 = vpop.f32.mrf.mxu1 }
 0x63a   : > { %v1479_v5 = vadd.f32 %v2334_v4, %v1469_v3 }
 0x63c   : > { %v2832_v21 = vadd.f32 %v1483_v2, %v1479_v5 }
 0x63e   : > { %v1488_v20 = vsel %vm592_vm2, %v2832_v21, 0.0 }
 0x63f   : > { %1489 = vadd.xlane.f32.xlu0 %v1488_v20 }
 0x641   : > { %v1471_v27 = vpop.f32.mrf.mxu1 }
 0x642   : > { %v1480_v61 = vadd.f32 %v2335_v7, %v1471_v27  ;;  %v2885_v7 = vld [vmem:[%s2503_s27] sm:$0x3f] }
 0x644   : > { %v2836_v29 = vadd.f32 %v1483_v2, %v1480_v61  ;;  %v1576_v61 = vperm.slane %v2885_v7, 3 }
 0x646   : > { %v1491_v9 = vsel %vm592_vm2, %v2836_v29, 0.0 }
 0x647   : > { %1492 = vadd.xlane.f32.xlu1 %v1491_v9 }
 0x649   : > { %v1474_v10 = vpop.f32.mrf.mxu1 }
 0x64a   : > { %v1481_v56 = vadd.f32 %v2336_v22, %v1474_v10 }
 0x64c   : > { %v2840_v50 = vadd.f32 %v1483_v2, %v1481_v56 }
 0x64e   : > { %v1494_v63 = vsel %vm592_vm2, %v2840_v50, 0.0 }
 0x64f   : > { %1495 = vadd.xlane.f32.xlu2 %v1494_v63 }
 0x651   : > { %v1476_v12 = vpop.f32.mrf.mxu1 }
 0x652   : > { %v1482_v53 = vadd.f32 %v2337_v15, %v1476_v12  ;;  %v1581_v15 = vperm.slane %v2885_v7, 4 }
 0x654   : > { %v2844_v39 = vadd.f32 %v1483_v2, %v1482_v53 }
 0x656   : > { %v1497_v31 = vsel %vm592_vm2, %v2844_v39, 0.0 }
 0x657   : > { %1498 = vadd.xlane.f32.xlu0 %v1497_v31 }
 0x6b2   : > { %v1490_v51 = vpop.xlane.xlu0 %1489 }
 0x6b3   : > { %v1500_v14 = vmul.f32 %v1490_v51, %v2565_v34 }
 0x6b5   : > { %v2850_v38 = vsub.f32 %v2832_v21, %v1500_v14 }
 0x6b7   : > { %v1508_v30 = vmul.f32 %v2850_v38, %v2850_v38 }
 0x6b9   : > { %v1512_v16 = vsel %vm592_vm2, %v1508_v30, 0.0 }
 0x6ba   : > { %v1493_v17 = vpop.xlane.xlu1 %1492  ;;  %1513 = vadd.xlane.f32.xlu1 %v1512_v16 }
 0x6bb   : > { %v1501_v18 = vmul.f32 %v1493_v17, %v2565_v34 }
 0x6bd   : > { %v2857_v58 = vsub.f32 %v2836_v29, %v1501_v18 }
 0x6bf   : > { %v1509_v23 = vmul.f32 %v2857_v58, %v2857_v58 }
 0x6c1   : > { %v1515_v25 = vsel %vm592_vm2, %v1509_v23, 0.0 }
 0x6c2   : > { %1516 = vadd.xlane.f32.xlu2 %v1515_v25  ;;  %v1496_v26 = vpop.xlane.xlu2 %1495 }
 0x6c3   : > { %v1502_v28 = vmul.f32 %v1496_v26, %v2565_v34 }
 0x6c5   : > { %v2864_v60 = vsub.f32 %v2840_v50, %v1502_v28 }
 0x6c7   : > { %v1510_v32 = vmul.f32 %v2864_v60, %v2864_v60 }
 0x6c9   : > { %v1518_v33 = vsel %vm592_vm2, %v1510_v32, 0.0 }
 0x6ca   : > { %1519 = vadd.xlane.f32.xlu0 %v1518_v33  ;;  %v1499_v44 = vpop.xlane.xlu0 %1498 }
 0x6cb   : > { %v1503_v35 = vmul.f32 %v1499_v44, %v2565_v34 }
 0x6cd   : > { %v2871_v36 = vsub.f32 %v2844_v39, %v1503_v35 }
 0x6cf   : > { %v1511_v8 = vmul.f32 %v2871_v36, %v2871_v36 }
 0x6d1   : > { %v1521_v37 = vsel %vm592_vm2, %v1511_v8, 0.0 }
 0x6d2   : > { %1522 = vadd.xlane.f32.xlu1 %v1521_v37 }
 0x6da   : > { %1605 = vrot.lane.b32.xlu2 %v2604_v55, %s2414_s15  ;;  %v1592_v55 = vperm.slane %v2338_v57, 1 }
 0x6de   : > { %1607 = vrot.lane.b32.xlu0 %v1592_v55, %s2414_s15 }
 0x72d   : > { %v1514_v40 = vpop.xlane.xlu1 %1513 }
 0x72e   : > { %v1524_v42 = vmul.f32 %v1514_v40, %v2565_v34 }
 0x730   : > { %v1528_v43 = vadd.f32 1e-05, %v1524_v42 }
 0x732   : > { %2310 = vrsqrt.f32 %v1528_v43  ;;  %vm1538_vm8 = vweird.f32 %v1528_v43 }
 0x735   : > { %v1517_v47 = vpop.xlane.xlu2 %1516 }
 0x736   : > { %v1525_v45 = vmul.f32 %v1517_v47, %v2565_v34 }
 0x738   : > { %v2311_v48 = vpop.eup %2310  ;;  %v1529_v52 = vadd.f32 1e-05, %v1525_v45 }
 0x739   : > { %v1533_v54 = vmul.f32 %v2311_v48, %v1528_v43  ;;  %vm1539_vm7 = vweird.f32 %v2311_v48 }
 0x73a   : > { %2312 = vrsqrt.f32 %v1529_v52  ;;  %vm1540_vm9 = vmor %vm1538_vm8, %vm1539_vm7  ;;  %vm1548_vm11 = vweird.f32 %v1529_v52 }
 0x73b   : > { %v1534_v11 = vmul.f32 %v2311_v48, %v1533_v54 }
 0x73d   : > { %v1535_v49 = vmul.f32 0.5, %v1534_v11  ;;  %v1520_v62 = vpop.xlane.xlu0 %1519  ;;  %v1606_v43 = vpop.permute.xlu2 %1605 }
 0x73e   : > { %v1526_v0 = vmul.f32 %v1520_v62, %v2565_v34 }
 0x73f   : > { %v1536_v59 = vsub.f32 1.5, %v1535_v49 }
 0x740   : > { %v2313_v13 = vpop.eup %2312  ;;  %v1530_v6 = vadd.f32 1e-05, %v1526_v0 }
 0x741   : > { %v1537_v1 = vmul.f32 %v2311_v48, %v1536_v59  ;;  %v1543_v19 = vmul.f32 %v2313_v13, %v1529_v52  ;;  %vm1549_vm10 = vweird.f32 %v2313_v13  ;;  %v2181_v59 = vld [vmem:[%s2528_s3 + $0x18] sm:$0xff] }
 0x742   : > { %2314 = vrsqrt.f32 %v1530_v6  ;;  %vm1550_vm12 = vmor %vm1548_vm11, %vm1549_vm10  ;;  %vm1558_vm14 = vweird.f32 %v1530_v6  ;;  %1797 = vmatpush.bf16.msra.mxu3 %v2181_v59 }
 0x743   : > { %v1544_v24 = vmul.f32 %v2313_v13, %v1543_v19  ;;  %v1541_v2 = vsel %vm1540_vm9, %v2311_v48, %v1537_v1 }
 0x744   : > { %v1572_v9 = vmul.f32 %v1541_v2, %v2850_v38 }
 0x745   : > { %v1545_v3 = vmul.f32 0.5, %v1544_v24  ;;  %v1523_v4 = vpop.xlane.xlu1 %1522 }
 0x746   : > { %v1527_v5 = vmul.f32 %v1523_v4, %v2565_v34  ;;  %v1577_v34 = vmul.f32 %v1576_v61, %v1572_v9 }
 0x747   : > { %v1546_v20 = vsub.f32 1.5, %v1545_v3  ;;  %v2180_v3 = vld [vmem:[%s2528_s3 + $0x10] sm:$0xff] }
 0x748   : > { %v2315_v27 = vpop.eup %2314  ;;  %v1531_v10 = vadd.f32 1e-05, %v1527_v5  ;;  %v1582_v16 = vadd.f32 %v1581_v15, %v1577_v34  ;;  %1798 = vmatpush.bf16.msra.mxu3 %v2180_v3 }
 0x749   : > { %v1547_v22 = vmul.f32 %v2313_v13, %v1546_v20  ;;  %v1553_v56 = vmul.f32 %v2315_v27, %v1530_v6  ;;  %vm1559_vm13 = vweird.f32 %v2315_v27 }
 0x74a   : > { %2316 = vrsqrt.f32 %v1531_v10  ;;  %vm1560_vm15 = vmor %vm1558_vm14, %vm1559_vm13  ;;  %vm1568_vm1 = vweird.f32 %v1531_v10 }
 0x74b   : > { %v1551_v63 = vsel %vm1550_vm12, %v2313_v13, %v1547_v22  ;;  %v1554_v12 = vmul.f32 %v2315_v27, %v1553_v56 }
 0x74c   : > { %v1573_v53 = vmul.f32 %v1551_v63, %v2857_v58 }
 0x74d   : > { %v1555_v31 = vmul.f32 0.5, %v1554_v12 }
 0x74e   : > { %v1578_v51 = vmul.f32 %v1576_v61, %v1573_v53 }
 0x74f   : > { %v1556_v14 = vsub.f32 1.5, %v1555_v31 }
 0x750   : > { %v2317_v30 = vpop.eup %2316  ;;  %v1583_v17 = vadd.f32 %v1581_v15, %v1578_v51  ;;  %v1608_v46 = vpop.permute.xlu0 %1607 }
 0x751   : > { %v1557_v38 = vmul.f32 %v2315_v27, %v1556_v14  ;;  %v1563_v18 = vmul.f32 %v2317_v30, %v1531_v10  ;;  %vm1569_vm0 = vweird.f32 %v2317_v30  ;;  %v1609_v47 = vsel %vm592_vm2, %v1606_v43, %v1608_v46  ;;  %v2179_v10 = vld [vmem:[%s2528_s3 + $0x8] sm:$0xff]  ;;  %v2178_v14 = vld [vmem:[%s2528_s3] sm:$0xff] }
 0x752   : > { %v1586_v23 = vpack.c.bf16 %v1583_v17, %v1582_v16  ;;  %vm1570_vm3 = vmor %vm1568_vm1, %vm1569_vm0  ;;  %1799 = vmatpush.bf16.msra.mxu3 %v2179_v10 }
 0x753   : > { %v1564_v25 = vmul.f32 %v2317_v30, %v1563_v18  ;;  %v1561_v26 = vsel %vm1560_vm15, %v2315_v27, %v1557_v38 }
 0x754   : > { %2128 = vmatmul.msk.bf16.vlgmr.msra.gmra.mxu2 %vm592_vm2, %v1586_v23  ;;  %v1574_v58 = vmul.f32 %v1561_v26, %v2864_v60 }
 0x755   : > { %v1565_v28 = vmul.f32 0.5, %v1564_v25 }
 0x756   : > { %v1579_v8 = vmul.f32 %v1576_v61, %v1574_v58  ;;  %1800 = vmatpush.bf16.msra.mxu3 %v2178_v14 }
 0x757   : > { %v1566_v32 = vsub.f32 1.5, %v1565_v28 }
 0x758   : > { %v1584_v40 = vadd.f32 %v1581_v15, %v1579_v8 }
 0x759   : > { %v1567_v33 = vmul.f32 %v2317_v30, %v1566_v32 }
 0x75b   : > { %v1571_v44 = vsel %vm1570_vm3, %v2317_v30, %v1567_v33 }
 0x75c   : > { %v1575_v35 = vmul.f32 %v1571_v44, %v2871_v36 }
 0x75e   : > { %v1580_v37 = vmul.f32 %v1576_v61, %v1575_v35 }
 0x760   : > { %v1585_v41 = vadd.f32 %v1581_v15, %v1580_v37 }
 0x762   : > { %v1587_v42 = vpack.c.bf16 %v1585_v41, %v1584_v40 }
 0x764   : > { %2129 = vmatmul.msk.bf16.gmra.mxu2 %vm592_vm2, %v1587_v42 }
 0x7d7   : > { %v1626_v45 = vpop.f32.mrf.mxu2 }
 0x7d8   : > { %v2896_v60 = vadd.f32 %v1626_v45, %v1609_v47 }
 0x7da   : > { %v2899_v48 = vmul.f32 0.70710677, %v2896_v60 }
 0x7dc   : > { %v1644_v36 = vand.u32 2147483647, %v2899_v48  ;;  %vm1732_vm4 = vcmp.lt.f32.partialorder %v2899_v48, 0.0 }
 0x7de   : > { %v1648_v52 = vmul.f32 0.3275911, %v1644_v36  ;;  %v1708_v20 = vsub.f32 0.0, %v1644_v36 }
 0x7df   : > { %v1628_v54 = vpop.f32.mrf.mxu2 }
 0x7e0   : > { %v1652_v11 = vadd.f32 1.0, %v1648_v52  ;;  %v2902_v57 = vadd.f32 %v1628_v54, %v1609_v47  ;;  %v1712_v15 = vmul.f32 %v1708_v20, %v1644_v36 }
 0x7e2   : > { %2318 = vrcp.f32 %v1652_v11  ;;  %v2905_v55 = vmul.f32 0.70710677, %v2902_v57  ;;  %v1716_v17 = vmul.f32 1.442695, %v1712_v15  ;;  %v1637_v48 = vmul.f32 0.5, %v2902_v57 }
 0x7e4   : > { %v1645_v49 = vand.u32 2147483647, %v2905_v55  ;;  %vm1733_vm5 = vcmp.lt.f32.partialorder %v2905_v55, 0.0 }
 0x7e6   : > { %v1649_v62 = vmul.f32 0.3275911, %v1645_v49  ;;  %v1709_v18 = vsub.f32 0.0, %v1645_v49 }
 0x7e7   : > { %v1631_v0 = vpop.f32.mrf.mxu2 }
 0x7e8   : > { %v2319_v13 = vpop.eup %2318  ;;  %v1653_v6 = vadd.f32 1.0, %v1649_v62  ;;  %v2909_v1 = vadd.f32 %v1631_v0, %v1609_v47  ;;  %v1713_v35 = vmul.f32 %v1709_v18, %v1645_v49 }
 0x7e9   : > { %v1660_v19 = vmul.f32 %v2319_v13, %v1652_v11 }
 0x7ea   : > { %2320 = vrcp.f32 %v1653_v6  ;;  %v2912_v24 = vmul.f32 0.70710677, %v2909_v1  ;;  %v1718_v46 = vmul.f32 1.442695, %v1713_v35  ;;  %v1636_v35 = vmul.f32 0.5, %v2896_v60 }
 0x7eb   : > { %v1664_v2 = vsub.f32 2.0, %v1660_v19 }
 0x7ec   : > { %v1646_v4 = vand.u32 2147483647, %v2912_v24  ;;  %vm1734_vm7 = vcmp.lt.f32.partialorder %v2912_v24, 0.0 }
 0x7ed   : > { %v1668_v5 = vmul.f32 %v2319_v13, %v1664_v2 }
 0x7ee   : > { %v1650_v27 = vmul.f32 0.3275911, %v1646_v4 }
 0x7ef   : > { %v1672_v61 = vmul.f32 1.0614054, %v1668_v5  ;;  %v1633_v9 = vpop.f32.mrf.mxu2 }
 0x7f0   : > { %v2321_v22 = vpop.eup %2320  ;;  %v1654_v56 = vadd.f32 1.0, %v1650_v27  ;;  %v2917_v63 = vadd.f32 %v1633_v9, %v1609_v47  ;;  %v1710_v47 = vsub.f32 0.0, %v1646_v4 }
 0x7f1   : > { %v1676_v12 = vadd.f32 -1.4531521, %v1672_v61  ;;  %v1661_v34 = vmul.f32 %v2321_v22, %v1653_v6 }
 0x7f2   : > { %2322 = vrcp.f32 %v1654_v56  ;;  %v2920_v53 = vmul.f32 0.70710677, %v2917_v63  ;;  %v1714_v49 = vmul.f32 %v1710_v47, %v1646_v4 }
 0x7f3   : > { %v1680_v31 = vmul.f32 %v1676_v12, %v1668_v5  ;;  %v1665_v51 = vsub.f32 2.0, %v1661_v34  ;;  %2324 = vpow2.f32 %v1716_v17 }
 0x7f4   : > { %v1647_v30 = vand.u32 2147483647, %v2920_v53  ;;  %v1720_v9 = vmul.f32 1.442695, %v1714_v49  ;;  %vm1735_vm8 = vcmp.lt.f32.partialorder %v2920_v53, 0.0 }
 0x7f5   : > { %v1684_v16 = vadd.f32 1.4214138, %v1680_v31  ;;  %v1669_v38 = vmul.f32 %v2321_v22, %v1665_v51 }
 0x7f6   : > { %v1651_v23 = vmul.f32 0.3275911, %v1647_v30  ;;  %v1711_v10 = vsub.f32 0.0, %v1647_v30 }
 0x7f7   : > { %v1688_v25 = vmul.f32 %v1684_v16, %v1668_v5  ;;  %v1673_v26 = vmul.f32 1.0614054, %v1669_v38 }
 0x7f8   : > { %v2323_v28 = vpop.eup %2322  ;;  %v1655_v32 = vadd.f32 1.0, %v1651_v23  ;;  %v1715_v4 = vmul.f32 %v1711_v10, %v1647_v30 }
 0x7f9   : > { %v1692_v58 = vadd.f32 -0.28449672, %v1688_v25  ;;  %v1677_v33 = vadd.f32 -1.4531521, %v1673_v26  ;;  %v1662_v44 = vmul.f32 %v2323_v28, %v1654_v56  ;;  %v2325_v45 = vpop.eup %2324 }
 0x7fa   : > { %2326 = vrcp.f32 %v1655_v32 }
 0x7fb   : > { %v1696_v8 = vmul.f32 %v1692_v58, %v1668_v5  ;;  %v1681_v37 = vmul.f32 %v1677_v33, %v1669_v38  ;;  %v1666_v40 = vsub.f32 2.0, %v1662_v44  ;;  %2328 = vpow2.f32 %v1718_v46 }
 0x7fc   : > { %2330 = vpow2.f32 %v1720_v9 }
 0x7fd   : > { %v1700_v41 = vadd.f32 0.2548296, %v1696_v8  ;;  %v1685_v42 = vadd.f32 1.4214138, %v1681_v37  ;;  %v1670_v43 = vmul.f32 %v2323_v28, %v1666_v40 }
 0x7ff   : > { %v1704_v36 = vmul.f32 %v1700_v41, %v1668_v5  ;;  %v1689_v52 = vmul.f32 %v1685_v42, %v1669_v38  ;;  %v1674_v54 = vmul.f32 1.0614054, %v1670_v43 }
 0x800   : > { %v2327_v11 = vpop.eup %2326 }
 0x801   : > { %v1724_v62 = vmul.f32 %v2325_v45, %v1704_v36  ;;  %v1693_v0 = vadd.f32 -0.28449672, %v1689_v52  ;;  %v1678_v59 = vadd.f32 -1.4531521, %v1674_v54  ;;  %v1663_v13 = vmul.f32 %v2327_v11, %v1655_v32  ;;  %v2329_v15 = vpop.eup %2328 }
 0x802   : > { %v2331_v44 = vpop.eup %2330 }
 0x803   : > { %v1728_v6 = vsub.f32 1.0, %v1724_v62  ;;  %v1697_v19 = vmul.f32 %v1693_v0, %v1669_v38  ;;  %v1682_v2 = vmul.f32 %v1678_v59, %v1670_v43  ;;  %v1667_v3 = vsub.f32 2.0, %v1663_v13 }
 0x804   : > { %v1638_v0 = vmul.f32 0.5, %v2909_v1  ;;  %v1639_v59 = vmul.f32 0.5, %v2917_v63 }
 0x805   : > { %v1701_v20 = vadd.f32 0.2548296, %v1697_v19  ;;  %v1686_v27 = vadd.f32 1.4214138, %v1682_v2  ;;  %v1671_v61 = vmul.f32 %v2327_v11, %v1667_v3  ;;  %v1736_v22 = vsub.f32 0.0, %v1728_v6 }
 0x806   : > { %v1816_v2 = vperm.slane %v2885_v7, 5 }
 0x807   : > { %v1705_v5 = vmul.f32 %v1701_v20, %v1669_v38  ;;  %v1690_v56 = vmul.f32 %v1686_v27, %v1670_v43  ;;  %v1675_v12 = vmul.f32 1.0614054, %v1671_v61  ;;  %v1740_v14 = vsel %vm1732_vm4, %v1736_v22, %v1728_v6 }
 0x808   : > { %v1744_v28 = vadd.f32 1.0, %v1740_v14  ;;  %v1722_v38 = vmul.f32 1.442695, %v1715_v4 }
 0x809   : > { %v1725_v34 = vmul.f32 %v2329_v15, %v1705_v5  ;;  %v1694_v31 = vadd.f32 -0.28449672, %v1690_v56  ;;  %v1679_v51 = vadd.f32 -1.4531521, %v1675_v12 }
 0x80a   : > { %v1748_v40 = vmul.f32 %v1744_v28, %v1636_v35  ;;  %2332 = vpow2.f32 %v1722_v38 }
 0x80b   : > { %v1729_v16 = vsub.f32 1.0, %v1725_v34  ;;  %v1698_v17 = vmul.f32 %v1694_v31, %v1670_v43  ;;  %v1683_v18 = vmul.f32 %v1679_v51, %v1671_v61 }
 0x80d   : > { %v1737_v23 = vsub.f32 0.0, %v1729_v16  ;;  %v1702_v25 = vadd.f32 0.2548296, %v1698_v17  ;;  %v1687_v26 = vadd.f32 1.4214138, %v1683_v18 }
 0x80f   : > { %v1741_v32 = vsel %vm1733_vm5, %v1737_v23, %v1729_v16  ;;  %v1706_v58 = vmul.f32 %v1702_v25, %v1670_v43  ;;  %v1691_v33 = vmul.f32 %v1687_v26, %v1671_v61 }
 0x810   : > { %v1745_v30 = vadd.f32 1.0, %v1741_v32  ;;  %v2333_v36 = vpop.eup %2332 }
 0x811   : > { %v1726_v8 = vmul.f32 %v2331_v44, %v1706_v58  ;;  %v1695_v37 = vadd.f32 -0.28449672, %v1691_v33 }
 0x812   : > { %v1749_v41 = vmul.f32 %v1745_v30, %v1637_v48 }
 0x813   : > { %v1730_v42 = vsub.f32 1.0, %v1726_v8  ;;  %v1699_v46 = vmul.f32 %v1695_v37, %v1671_v61 }
 0x814   : > { %v1752_v47 = vpack.c.bf16 %v1749_v41, %v1748_v40 }
 0x815   : > { %v1703_v55 = vadd.f32 0.2548296, %v1699_v46  ;;  %v1738_v43 = vsub.f32 0.0, %v1730_v42 }
 0x816   : > { %2146 = vmatmul.msk.bf16.vlgmr.msra.gmra.mxu3 %vm1786_vm6, %v1752_v47 }
 0x817   : > { %v1707_v45 = vmul.f32 %v1703_v55, %v1671_v61  ;;  %v1742_v60 = vsel %vm1734_vm7, %v1738_v43, %v1730_v42 }
 0x818   : > { %v1746_v11 = vadd.f32 1.0, %v1742_v60 }
 0x819   : > { %v1727_v52 = vmul.f32 %v2333_v36, %v1707_v45 }
 0x81a   : > { %v1750_v49 = vmul.f32 %v1746_v11, %v1638_v0 }
 0x81b   : > { %v1731_v57 = vsub.f32 1.0, %v1727_v52 }
 0x81d   : > { %v1739_v54 = vsub.f32 0.0, %v1731_v57 }
 0x81f   : > { %v1743_v62 = vsel %vm1735_vm8, %v1739_v54, %v1731_v57 }
 0x820   : > { %v1747_v13 = vadd.f32 1.0, %v1743_v62 }
 0x822   : > { %v1751_v6 = vmul.f32 %v1747_v13, %v1639_v59 }
 0x824   : > { %v1753_v19 = vpack.c.bf16 %v1751_v6, %v1750_v49 }
 0x826   : > { %2147 = vmatmul.msk.bf16.gmra.mxu3 %vm1786_vm6, %v1753_v19 }
 0x899   : > { %v1802_v24 = vpop.f32.mrf.mxu3 }
 0x89a   : > { %v1812_v3 = vadd.f32 %v1802_v24, %v2832_v21 }
 0x89c   : > { %v1817_v20 = vadd.f32 %v1816_v2, %v1812_v3 }
 0x89e   : > { %1821 = vst.msk [vmem:[#allocation2] sm:$0xff] %vm592_vm2, %v1817_v20 }
 0x8a1   : > { %v1804_v53 = vpop.f32.mrf.mxu3 }
 0x8a2   : > { %v1813_v27 = vadd.f32 %v1804_v53, %v2836_v29 }
 0x8a4   : > { %v1818_v1 = vadd.f32 %v1816_v2, %v1813_v27 }
 0x8a6   : > { %1822 = vst.msk [vmem:[#allocation2 + $0x8] sm:$0xff] %vm592_vm2, %v1818_v1 }
 0x8a9   : > { %v1807_v63 = vpop.f32.mrf.mxu3 }
 0x8aa   : > { %v1814_v61 = vadd.f32 %v1807_v63, %v2840_v50 }
 0x8ac   : > { %v1819_v9 = vadd.f32 %v1816_v2, %v1814_v61 }
 0x8ae   : > { %1823 = vst.msk [vmem:[#allocation2 + $0x10] sm:$0xff] %vm592_vm2, %v1819_v9 }
 0x8b1   : > { %v1809_v10 = vpop.f32.mrf.mxu3 }
 0x8b2   : > { %v1815_v7 = vadd.f32 %v1809_v10, %v2844_v39  ;;  %1828 = sbr.rel (%p2148_p6) target bundleno = 2396 (0x95c), region = 72 }
 0x8b4   : > { %v1820_v22 = vadd.f32 %v1816_v2, %v1815_v7 }
 0x8b6   : > { %1824 = vst.msk [vmem:[#allocation2 + $0x18] sm:$0xff] %vm592_vm2, %v1820_v22 }
 0x8b7   : > { %v2183_v21 = vld [vmem:[%s2981_s9 + $0x8] sm:$0xff]  ;;  %v1829_v29 = vld [vmem:[#allocation2] sm:$0xff]  ;;  %v1831_v56 = vld [vmem:[#allocation2 + $0x10] sm:$0xff]  ;;  %v2415_v15 = vmov 16.0   ;;  %vm1874_vm10 = vcmask 1041409  }
 0x8b8   : > { %v1830_v5 = vld [vmem:[#allocation2 + $0x8] sm:$0xff]  ;;  %v1833_v12 = vsel %vm592_vm2, %v1829_v29, 0.0  ;;  %2341 = vrcp.f32 %v2415_v15  ;;  %1898 = vmatpush.bf16.msra.mxu0 %v2183_v21  ;;  %v2182_v39 = vld [vmem:[%s2981_s9] sm:$0xff]  ;;  %v1842_v31 = vsel %vm592_vm2, %v1831_v56, 0.0 }
 0x8b9   : > { %v1834_v34 = vsel %vm592_vm2, %v1830_v5, 0.0  ;;  %v2340_v52 = vld [vmem:[%s2982_s10] ss:$0 sm:$0xff] }
 0x8ba   : > { %v1835_v4 = vadd.f32 %v1834_v34, %v1833_v12 }
 0x8bc   : > { %v1836_v16 = vrot.slane %v1835_v4, 4  ;;  %1899 = vmatpush.bf16.msra.mxu0 %v2182_v39 }
 0x8bd   : > { %v1832_v50 = vld [vmem:[#allocation2 + $0x18] sm:$0xff] }
 0x8be   : > { %v1843_v51 = vsel %vm592_vm2, %v1832_v50, 0.0  ;;  %v2342_v18 = vpop.eup %2341  ;;  %v1837_v23 = vadd.f32 %v1836_v16, %v1835_v4 }
 0x8bf   : > { %v1844_v14 = vadd.f32 %v1843_v51, %v1842_v31  ;;  %v1852_v26 = vmul.f32 16.0, %v2342_v18  ;;  %vm1856_vm9 = vweird.f32 %v2342_v18 }
 0x8c0   : > { %v1838_v28 = vrot.slane %v1837_v23, 2 }
 0x8c1   : > { %v1845_v17 = vrot.slane %v1844_v14, 4  ;;  %v1853_v32 = vsub.f32 1.0, %v1852_v26 }
 0x8c2   : > { %v1839_v58 = vadd.f32 %v1838_v28, %v1837_v23 }
 0x8c3   : > { %v1846_v25 = vadd.f32 %v1845_v17, %v1844_v14  ;;  %v1854_v44 = vmul.f32 %v2342_v18, %v1853_v32 }
 0x8c4   : > { %v1840_v35 = vrot.slane %v1839_v58, 1 }
 0x8c5   : > { %v1847_v38 = vrot.slane %v1846_v25, 2  ;;  %v1855_v30 = vadd.f32 %v2342_v18, %v1854_v44 }
 0x8c6   : > { %v1841_v8 = vadd.f32 %v1840_v35, %v1839_v58 }
 0x8c7   : > { %v1848_v33 = vadd.f32 %v1847_v38, %v1846_v25  ;;  %v1857_v40 = vsel %vm1856_vm9, %v2342_v18, %v1855_v30 }
 0x8c8   : > { %v1858_v41 = vmul.f32 %v1857_v40, %v1841_v8 }
 0x8c9   : > { %v1849_v48 = vrot.slane %v1848_v33, 1 }
 0x8ca   : > { %v1860_v46 = vpack.c.bf16 %v1858_v41, %v1858_v41 }
 0x8cb   : > { %v1850_v37 = vadd.f32 %v1849_v48, %v1848_v33 }
 0x8cc   : > { %v1872_v55 = vunpack.c.l.b16 %v1860_v46 }
 0x8cd   : > { %v1859_v42 = vmul.f32 %v1857_v40, %v1850_v37 }
 0x8cf   : > { %v1861_v47 = vpack.c.bf16 %v1859_v42, %v1859_v42 }
 0x8d1   : > { %v1873_v43 = vunpack.c.l.b16 %v1861_v47 }
 0x8d3   : > { %v1875_v45 = vsel %vm1874_vm10, %v1873_v43, %v1872_v55 }
 0x8d4   : > { %v1876_v36 = vpack.c.b16 %v1875_v45, %v1875_v45 }
 0x8d6   : > { %2157 = vmatmul.msk.bf16.vlgmr.msra.gmra.mxu0 %vm592_vm2, %v1876_v36 }
 0x953   : > { %v1901_v60 = vpop.f32.mrf.mxu0 }
 0x954   : > { %v1902_v57 = vadd.f32 %v2340_v52, %v1901_v60 }
 0x956   : > { %1905 = vst [vmem:[#allocation4] sm:$0x3] %v1902_v57 }
 0x95b   : > { %v1903_v54 = vpop.f32.mrf.mxu0 }
 0x95c PF: > { %s2989_s26 = sadd.s32 4294967295, %s2397_s19   ;;  %s1916_s13 = sshll.u32 %s2983_s11, 4  ;;  %s1917_s13 = int_to_ptr.hbm [resolvable:$true] %s1916_s13 }
 0x95d   : > { %p2192_p7 = scmp.eq.s32.totalorder %s2989_s26, 1  ;;  %s2416_s14 = smov [#allocation4]  }
 0x95e   : > { %s1914_s20 = sshll.u32 %s2416_s14, 4  ;;  %s1915_s20 = int_to_ptr.vmem [resolvable:$true] %s1914_s20 }
 0x95f   : > { %2189 = dma.vmem_to_hbm [thread:$0]  (%p2192_p7), %s1915_s20, 32, %s1917_s13, [#allocation5]  }
 0x960   : > { %2384 = dma.done.wait (%p2192_p7), [#allocation5], 32  }
 0x961   : > { %2386 = vsyncadd (%p2192_p7), [#allocation5], 4294967264 }
 0x962 PF: > { %s22_s19 = sadd.s32 1, %s2397_s19   ;;  %s2990_s17 = sld [smem:[#allocation7_spill]] }
 0x963   : > { %p19_p8 = scmp.ge.s32.totalorder %s22_s19, 4   ;;  %s2991_s18 = sld [smem:[#allocation8_spill]] }
 0x965   :  { %21 = sbr.rel (!%p19_p8) target bundleno = 4 (0x4), region = 118 }
 0x96a   :  { %1930 = vsyncpa [#allocation5], 1 }
 0x96b   :  { %1932 = vsyncpa [#allocation5 + $0x1], 1 }

</bundles_post_ra>
